<compile_context>
chip_gen: v5e
topology: v5e:2x2
jax: 0.10.0
libtpu: 0.0.40
codegen_flags: <defaults>
</compile_context>

<pallas_src>
import functools

import jax
import jax.numpy as jnp
from jax import lax
from jax.experimental import pallas as pl
from jax.experimental.pallas import tpu as pltpu


# ----------------------------------------------------------------------------
# Kernel: full multi-head attention for one batch element
# ----------------------------------------------------------------------------
def _mha_kernel(q_ref, k_ref, v_ref,
                wq_ref, bq_ref, wk_ref, bk_ref, wv_ref, bv_ref,
                wm_ref, bm_ref, o_ref, *, num_heads, head_dim):
    # q_ref/k_ref/v_ref : (1, N, C) channels-last inputs for this batch element
    # w*_ref            : (C, C)  projection weights (head-major output cols)
    # b*_ref            : (1, C)  biases
    # o_ref             : (1, N, C) output (channels-last)
    xq = q_ref[0]                       # (N, C) f32
    xk = k_ref[0]
    xv = v_ref[0]

    # QKV projections: three full-width MXU dots (f32 accumulate).
    q = jnp.dot(xq, wq_ref[...], preferred_element_type=jnp.float32) + bq_ref[...]
    k = jnp.dot(xk, wk_ref[...], preferred_element_type=jnp.float32) + bk_ref[...]
    v = jnp.dot(xv, wv_ref[...], preferred_element_type=jnp.float32) + bv_ref[...]

    scale = 1.0 / (float(head_dim) ** 0.5)

    outs = []
    for hh in range(num_heads):         # static, small head count
        sl = slice(hh * head_dim, (hh + 1) * head_dim)
        q_h = q[:, sl]                  # (N, dh) contiguous head-major block
        k_h = k[:, sl]
        v_h = v[:, sl]

        # scores (N, N): contract last dims of both operands -- no explicit k.T
        s = lax.dot_general(q_h, k_h, (((1,), (1,)), ((), ())),
                            preferred_element_type=jnp.float32) * scale

        # numerically stable softmax over the last (key) axis
        m = jnp.max(s, axis=-1, keepdims=True)
        p = jnp.exp(s - m)
        l = jnp.sum(p, axis=-1, keepdims=True)
        prob = p / l

        # attention-weighted values: (N, N) @ (N, dh)
        outs.append(jnp.dot(prob, v_h, preferred_element_type=jnp.float32))

    ctx = jnp.concatenate(outs, axis=-1)            # (N, C) head-major channels
    y = jnp.dot(ctx, wm_ref[...], preferred_element_type=jnp.float32) + bm_ref[...]
    o_ref[0] = y.astype(o_ref.dtype)


def _mha_pallas(q, k, v, wq, bq, wk, bk, wv, bv, wm, bm, *, num_heads):
    """q/k/v: (B, N, C) channels-last. Returns (B, N, C) channels-last."""
    B, N, C = q.shape
    head_dim = C // num_heads

    kernel = functools.partial(_mha_kernel, num_heads=num_heads,
                               head_dim=head_dim)

    x_spec = pl.BlockSpec((1, N, C), lambda b: (b, 0, 0))
    w_spec = pl.BlockSpec((C, C), lambda b: (0, 0))   # constant -> DMA'd once
    b_spec = pl.BlockSpec((1, C), lambda b: (0, 0))

    return pl.pallas_call(
        kernel,
        out_shape=jax.ShapeDtypeStruct((B, N, C), q.dtype),
        grid_spec=pltpu.PrefetchScalarGridSpec(
            num_scalar_prefetch=0,
            grid=(B,),
            in_specs=[x_spec, x_spec, x_spec,
                      w_spec, b_spec, w_spec, b_spec, w_spec, b_spec,
                      w_spec, b_spec],
            out_specs=x_spec,
        ),
        compiler_params=pltpu.CompilerParams(
            dimension_semantics=("parallel",)),
    )(q, k, v, wq, bq, wk, bk, wv, bv, wm, bm)


# ----------------------------------------------------------------------------
# Module wrapper (mirrors the PyTorch MultiHeadedAttention interface)
# ----------------------------------------------------------------------------
class MultiHeadedAttentionPallas:
    def __init__(self, h, d_model, key=None):
        assert d_model % h == 0
        self.h = h
        self.d_model = d_model
        self.dim = d_model // h

        if key is None:
            key = jax.random.PRNGKey(0)
        kw = jax.random.split(key, 8)
        wscale = 1.0 / jnp.sqrt(jnp.float32(d_model))

        def init_w(k):
            # (C_in, C_out) layout == torch Conv1d(k=1) weight transposed.
            return jax.random.normal(k, (d_model, d_model), jnp.float32) * wscale

        def init_b(k):
            return jax.random.normal(k, (d_model,), jnp.float32) * 0.1

        # NOTE: the torch module deepcopies one conv 4x (identical init);
        # independent random params here exercise the same forward math.
        self.wq, self.wk, self.wv, self.wm = [init_w(k) for k in kw[:4]]
        self.bq, self.bk, self.bv, self.bm = [init_b(k) for k in kw[4:]]

        # Head-major channel permutation:  j = head*dim + d  <->  torch channel
        # c = d*h + head (from `.view(b, dim, h, N)`).  Permuting the proj
        # output columns and the merge input rows once here lets the kernel
        # slice contiguous per-head blocks with zero in-kernel relayout.
        d_idx = jnp.arange(self.dim)
        h_idx = jnp.arange(self.h)
        perm = (d_idx[None, :] * self.h + h_idx[:, None]).reshape(-1)

        self._wq_hm = self.wq[:, perm]
        self._wk_hm = self.wk[:, perm]
        self._wv_hm = self.wv[:, perm]
        self._bq_hm = self.bq[perm][None, :]
        self._bk_hm = self.bk[perm][None, :]
        self._bv_hm = self.bv[perm][None, :]
        self._wm_hm = self.wm[perm, :]
        self._bm_2d = self.bm[None, :]

    def forward(self, query, key, value):
        # query/key/value: (B, d_model, N) channels-first, like the torch module.
        q_cl = jnp.transpose(query, (0, 2, 1))
        k_cl = jnp.transpose(key, (0, 2, 1))
        v_cl = jnp.transpose(value, (0, 2, 1))
        out_cl = _mha_pallas(q_cl, k_cl, v_cl,
                             self._wq_hm, self._bq_hm,
                             self._wk_hm, self._bk_hm,
                             self._wv_hm, self._bv_hm,
                             self._wm_hm, self._bm_2d,
                             num_heads=self.h)
        return jnp.transpose(out_cl, (0, 2, 1))      # (B, d_model, N)


# ----------------------------------------------------------------------------
# Pure-JAX reference mirroring the PyTorch module exactly
# ----------------------------------------------------------------------------
def _reference(query, key, value, wq, bq, wk, bk, wv, bv, wm, bm, h):
    B, C, N = query.shape
    dim = C // h
    prec = lax.Precision.HIGHEST

    def conv1x1(x, w, b):   # torch Conv1d(kernel_size=1) with (C_in,C_out) weight
        return jnp.einsum('bin,io->bon', x, w, precision=prec) + b[None, :, None]

    q = conv1x1(query, wq, bq).reshape(B, dim, h, N)
    k = conv1x1(key, wk, bk).reshape(B, dim, h, N)
    v = conv1x1(value, wv, bv).reshape(B, dim, h, N)
    scores = jnp.einsum('bdhn,bdhm->bhnm', q, k, precision=prec) / (dim ** 0.5)
    prob = jax.nn.softmax(scores, axis=-1)
    x = jnp.einsum('bhnm,bdhm->bdhn', prob, v, precision=prec)
    x = x.reshape(B, dim * h, N)
    return conv1x1(x, wm, bm)


if __name__ == "__main__":
    B, d_model, num_heads, N = 2, 128, 4, 32   # d_model=128 -> lane-dense stores
    root = jax.random.PRNGKey(0)
    kq, kk, kv, kparams = jax.random.split(root, 4)

    query = jax.random.normal(kq, (B, d_model, N), jnp.float32)
    key_t = jax.random.normal(kk, (B, d_model, N), jnp.float32)
    value = jax.random.normal(kv, (B, d_model, N), jnp.float32)

    mha = MultiHeadedAttentionPallas(num_heads, d_model, key=kparams)
    out = jax.block_until_ready(mha.forward(query, key_t, value))

    ref = _reference(query, key_t, value,
                     mha.wq, mha.bq, mha.wk, mha.bk, mha.wv, mha.bv,
                     mha.wm, mha.bm, num_heads)

    assert out.shape == (B, d_model, N)
    assert jnp.allclose(out, ref, atol=2e-3, rtol=2e-3), \
        float(jnp.max(jnp.abs(out - ref)))

    print("KERNEL_OK")
</pallas_src>

<mosaic_0001>
module attributes {stable_mosaic.version = 11 : i64} {
  func.func @_mha_kernel(%arg0: i32, %arg1: memref<1x32x128xf32, #tpu.memory_space<vmem>>, %arg2: memref<1x32x128xf32, #tpu.memory_space<vmem>>, %arg3: memref<1x32x128xf32, #tpu.memory_space<vmem>>, %arg4: memref<128x128xf32, #tpu.memory_space<vmem>>, %arg5: memref<1x128xf32, #tpu.memory_space<vmem>>, %arg6: memref<128x128xf32, #tpu.memory_space<vmem>>, %arg7: memref<1x128xf32, #tpu.memory_space<vmem>>, %arg8: memref<128x128xf32, #tpu.memory_space<vmem>>, %arg9: memref<1x128xf32, #tpu.memory_space<vmem>>, %arg10: memref<128x128xf32, #tpu.memory_space<vmem>>, %arg11: memref<1x128xf32, #tpu.memory_space<vmem>>, %arg12: memref<1x32x128xf32, #tpu.memory_space<vmem>>) attributes {dimension_semantics = [#tpu.dimension_semantics<parallel>], iteration_bounds = array<i64: 2>, scalar_prefetch = 0 : i64, scratch_operands = 0 : i64, tpu.core_type = #tpu.core_type<tc>, window_params = [{transform_indices = @transform_0, window_bounds = array<i64: 1, 32, 128>}, {transform_indices = @transform_1, window_bounds = array<i64: 1, 32, 128>}, {transform_indices = @transform_2, window_bounds = array<i64: 1, 32, 128>}, {pipeline_mode = #tpu.pipeline_mode<synchronous>, transform_indices = @transform_3, window_bounds = array<i64: 128, 128>}, {pipeline_mode = #tpu.pipeline_mode<synchronous>, transform_indices = @transform_4, window_bounds = array<i64: 1, 128>}, {pipeline_mode = #tpu.pipeline_mode<synchronous>, transform_indices = @transform_5, window_bounds = array<i64: 128, 128>}, {pipeline_mode = #tpu.pipeline_mode<synchronous>, transform_indices = @transform_6, window_bounds = array<i64: 1, 128>}, {pipeline_mode = #tpu.pipeline_mode<synchronous>, transform_indices = @transform_7, window_bounds = array<i64: 128, 128>}, {pipeline_mode = #tpu.pipeline_mode<synchronous>, transform_indices = @transform_8, window_bounds = array<i64: 1, 128>}, {pipeline_mode = #tpu.pipeline_mode<synchronous>, transform_indices = @transform_9, window_bounds = array<i64: 128, 128>}, {pipeline_mode = #tpu.pipeline_mode<synchronous>, transform_indices = @transform_10, window_bounds = array<i64: 1, 128>}, {transform_indices = @transform_11, window_bounds = array<i64: 1, 32, 128>}]} {
    %c0 = arith.constant 0 : index
    %c0_0 = arith.constant 0 : index
    %c0_1 = arith.constant 0 : index
    %0 = vector.load %arg1[%c0, %c0_0, %c0_1] : memref<1x32x128xf32, #tpu.memory_space<vmem>>, vector<1x32x128xf32>
    %1 = vector.shape_cast %0 : vector<1x32x128xf32> to vector<32x128xf32>
    %c0_2 = arith.constant 0 : index
    %c0_3 = arith.constant 0 : index
    %c0_4 = arith.constant 0 : index
    %2 = vector.load %arg2[%c0_2, %c0_3, %c0_4] : memref<1x32x128xf32, #tpu.memory_space<vmem>>, vector<1x32x128xf32>
    %3 = vector.shape_cast %2 : vector<1x32x128xf32> to vector<32x128xf32>
    %c0_5 = arith.constant 0 : index
    %c0_6 = arith.constant 0 : index
    %c0_7 = arith.constant 0 : index
    %4 = vector.load %arg3[%c0_5, %c0_6, %c0_7] : memref<1x32x128xf32, #tpu.memory_space<vmem>>, vector<1x32x128xf32>
    %5 = vector.shape_cast %4 : vector<1x32x128xf32> to vector<32x128xf32>
    %c0_8 = arith.constant 0 : index
    %c0_9 = arith.constant 0 : index
    %6 = vector.load %arg4[%c0_8, %c0_9] : memref<128x128xf32, #tpu.memory_space<vmem>>, vector<128x128xf32>
    %cst = arith.constant dense<0.000000e+00> : vector<32x128xf32>
    %7 = tpu.matmul %1, %6, %cst {dimension_numbers = #tpu.dot_dimension_numbers<[1], [0], [0], [1], [0, 0, 1, 1], [], []>} : vector<32x128xf32>, vector<128x128xf32>, vector<32x128xf32> -> vector<32x128xf32>
    %c0_10 = arith.constant 0 : index
    %c0_11 = arith.constant 0 : index
    %8 = vector.load %arg5[%c0_10, %c0_11] : memref<1x128xf32, #tpu.memory_space<vmem>>, vector<1x128xf32>
    %9 = vector.broadcast %8 : vector<1x128xf32> to vector<32x128xf32>
    %10 = arith.addf %7, %9 : vector<32x128xf32>
    %c0_12 = arith.constant 0 : index
    %c0_13 = arith.constant 0 : index
    %11 = vector.load %arg6[%c0_12, %c0_13] : memref<128x128xf32, #tpu.memory_space<vmem>>, vector<128x128xf32>
    %cst_14 = arith.constant dense<0.000000e+00> : vector<32x128xf32>
    %12 = tpu.matmul %3, %11, %cst_14 {dimension_numbers = #tpu.dot_dimension_numbers<[1], [0], [0], [1], [0, 0, 1, 1], [], []>} : vector<32x128xf32>, vector<128x128xf32>, vector<32x128xf32> -> vector<32x128xf32>
    %c0_15 = arith.constant 0 : index
    %c0_16 = arith.constant 0 : index
    %13 = vector.load %arg7[%c0_15, %c0_16] : memref<1x128xf32, #tpu.memory_space<vmem>>, vector<1x128xf32>
    %14 = vector.broadcast %13 : vector<1x128xf32> to vector<32x128xf32>
    %15 = arith.addf %12, %14 : vector<32x128xf32>
    %c0_17 = arith.constant 0 : index
    %c0_18 = arith.constant 0 : index
    %16 = vector.load %arg8[%c0_17, %c0_18] : memref<128x128xf32, #tpu.memory_space<vmem>>, vector<128x128xf32>
    %cst_19 = arith.constant dense<0.000000e+00> : vector<32x128xf32>
    %17 = tpu.matmul %5, %16, %cst_19 {dimension_numbers = #tpu.dot_dimension_numbers<[1], [0], [0], [1], [0, 0, 1, 1], [], []>} : vector<32x128xf32>, vector<128x128xf32>, vector<32x128xf32> -> vector<32x128xf32>
    %c0_20 = arith.constant 0 : index
    %c0_21 = arith.constant 0 : index
    %18 = vector.load %arg9[%c0_20, %c0_21] : memref<1x128xf32, #tpu.memory_space<vmem>>, vector<1x128xf32>
    %19 = vector.broadcast %18 : vector<1x128xf32> to vector<32x128xf32>
    %20 = arith.addf %17, %19 : vector<32x128xf32>
    %21 = vector.extract_strided_slice %10 {offsets = [0, 0], sizes = [32, 32], strides = [1, 1]} : vector<32x128xf32> to vector<32x32xf32>
    %22 = vector.extract_strided_slice %15 {offsets = [0, 0], sizes = [32, 32], strides = [1, 1]} : vector<32x128xf32> to vector<32x32xf32>
    %23 = vector.extract_strided_slice %20 {offsets = [0, 0], sizes = [32, 32], strides = [1, 1]} : vector<32x128xf32> to vector<32x32xf32>
    %cst_22 = arith.constant dense<0.000000e+00> : vector<32x32xf32>
    %24 = tpu.matmul %21, %22, %cst_22 {dimension_numbers = #tpu.dot_dimension_numbers<[1], [1], [0], [0], [0, 0, 1, 0], [], []>} : vector<32x32xf32>, vector<32x32xf32>, vector<32x32xf32> -> vector<32x32xf32>
    %cst_23 = arith.constant 0.176776692 : f32
    %25 = vector.broadcast %cst_23 : f32 to vector<32x32xf32>
    %26 = arith.mulf %24, %25 : vector<32x32xf32>
    %cst_24 = arith.constant dense<0xFF800000> : vector<32xf32>
    %27 = vector.multi_reduction <maximumf>, %26, %cst_24 [1] : vector<32x32xf32> to vector<32xf32>
    %28 = vector.shape_cast %27 : vector<32xf32> to vector<32x1xf32>
    %29 = vector.broadcast %28 : vector<32x1xf32> to vector<32x32xf32>
    %30 = arith.subf %26, %29 : vector<32x32xf32>
    %31 = math.exp %30 : vector<32x32xf32>
    %cst_25 = arith.constant dense<0.000000e+00> : vector<32xf32>
    %32 = vector.multi_reduction <add>, %31, %cst_25 [1] : vector<32x32xf32> to vector<32xf32>
    %33 = vector.shape_cast %32 : vector<32xf32> to vector<32x1xf32>
    %34 = vector.broadcast %33 : vector<32x1xf32> to vector<32x32xf32>
    %35 = arith.divf %31, %34 : vector<32x32xf32>
    %cst_26 = arith.constant dense<0.000000e+00> : vector<32x32xf32>
    %36 = tpu.matmul %35, %23, %cst_26 {dimension_numbers = #tpu.dot_dimension_numbers<[1], [0], [0], [1], [0, 0, 1, 1], [], []>} : vector<32x32xf32>, vector<32x32xf32>, vector<32x32xf32> -> vector<32x32xf32>
    %37 = vector.extract_strided_slice %10 {offsets = [0, 32], sizes = [32, 32], strides = [1, 1]} : vector<32x128xf32> to vector<32x32xf32>
    %38 = vector.extract_strided_slice %15 {offsets = [0, 32], sizes = [32, 32], strides = [1, 1]} : vector<32x128xf32> to vector<32x32xf32>
    %39 = vector.extract_strided_slice %20 {offsets = [0, 32], sizes = [32, 32], strides = [1, 1]} : vector<32x128xf32> to vector<32x32xf32>
    %cst_27 = arith.constant dense<0.000000e+00> : vector<32x32xf32>
    %40 = tpu.matmul %37, %38, %cst_27 {dimension_numbers = #tpu.dot_dimension_numbers<[1], [1], [0], [0], [0, 0, 1, 0], [], []>} : vector<32x32xf32>, vector<32x32xf32>, vector<32x32xf32> -> vector<32x32xf32>
    %cst_28 = arith.constant 0.176776692 : f32
    %41 = vector.broadcast %cst_28 : f32 to vector<32x32xf32>
    %42 = arith.mulf %40, %41 : vector<32x32xf32>
    %cst_29 = arith.constant dense<0xFF800000> : vector<32xf32>
    %43 = vector.multi_reduction <maximumf>, %42, %cst_29 [1] : vector<32x32xf32> to vector<32xf32>
    %44 = vector.shape_cast %43 : vector<32xf32> to vector<32x1xf32>
    %45 = vector.broadcast %44 : vector<32x1xf32> to vector<32x32xf32>
    %46 = arith.subf %42, %45 : vector<32x32xf32>
    %47 = math.exp %46 : vector<32x32xf32>
    %cst_30 = arith.constant dense<0.000000e+00> : vector<32xf32>
    %48 = vector.multi_reduction <add>, %47, %cst_30 [1] : vector<32x32xf32> to vector<32xf32>
    %49 = vector.shape_cast %48 : vector<32xf32> to vector<32x1xf32>
    %50 = vector.broadcast %49 : vector<32x1xf32> to vector<32x32xf32>
    %51 = arith.divf %47, %50 : vector<32x32xf32>
    %cst_31 = arith.constant dense<0.000000e+00> : vector<32x32xf32>
    %52 = tpu.matmul %51, %39, %cst_31 {dimension_numbers = #tpu.dot_dimension_numbers<[1], [0], [0], [1], [0, 0, 1, 1], [], []>} : vector<32x32xf32>, vector<32x32xf32>, vector<32x32xf32> -> vector<32x32xf32>
    %53 = vector.extract_strided_slice %10 {offsets = [0, 64], sizes = [32, 32], strides = [1, 1]} : vector<32x128xf32> to vector<32x32xf32>
    %54 = vector.extract_strided_slice %15 {offsets = [0, 64], sizes = [32, 32], strides = [1, 1]} : vector<32x128xf32> to vector<32x32xf32>
    %55 = vector.extract_strided_slice %20 {offsets = [0, 64], sizes = [32, 32], strides = [1, 1]} : vector<32x128xf32> to vector<32x32xf32>
    %cst_32 = arith.constant dense<0.000000e+00> : vector<32x32xf32>
    %56 = tpu.matmul %53, %54, %cst_32 {dimension_numbers = #tpu.dot_dimension_numbers<[1], [1], [0], [0], [0, 0, 1, 0], [], []>} : vector<32x32xf32>, vector<32x32xf32>, vector<32x32xf32> -> vector<32x32xf32>
    %cst_33 = arith.constant 0.176776692 : f32
    %57 = vector.broadcast %cst_33 : f32 to vector<32x32xf32>
    %58 = arith.mulf %56, %57 : vector<32x32xf32>
    %cst_34 = arith.constant dense<0xFF800000> : vector<32xf32>
    %59 = vector.multi_reduction <maximumf>, %58, %cst_34 [1] : vector<32x32xf32> to vector<32xf32>
    %60 = vector.shape_cast %59 : vector<32xf32> to vector<32x1xf32>
    %61 = vector.broadcast %60 : vector<32x1xf32> to vector<32x32xf32>
    %62 = arith.subf %58, %61 : vector<32x32xf32>
    %63 = math.exp %62 : vector<32x32xf32>
    %cst_35 = arith.constant dense<0.000000e+00> : vector<32xf32>
    %64 = vector.multi_reduction <add>, %63, %cst_35 [1] : vector<32x32xf32> to vector<32xf32>
    %65 = vector.shape_cast %64 : vector<32xf32> to vector<32x1xf32>
    %66 = vector.broadcast %65 : vector<32x1xf32> to vector<32x32xf32>
    %67 = arith.divf %63, %66 : vector<32x32xf32>
    %cst_36 = arith.constant dense<0.000000e+00> : vector<32x32xf32>
    %68 = tpu.matmul %67, %55, %cst_36 {dimension_numbers = #tpu.dot_dimension_numbers<[1], [0], [0], [1], [0, 0, 1, 1], [], []>} : vector<32x32xf32>, vector<32x32xf32>, vector<32x32xf32> -> vector<32x32xf32>
    %69 = vector.extract_strided_slice %10 {offsets = [0, 96], sizes = [32, 32], strides = [1, 1]} : vector<32x128xf32> to vector<32x32xf32>
    %70 = vector.extract_strided_slice %15 {offsets = [0, 96], sizes = [32, 32], strides = [1, 1]} : vector<32x128xf32> to vector<32x32xf32>
    %71 = vector.extract_strided_slice %20 {offsets = [0, 96], sizes = [32, 32], strides = [1, 1]} : vector<32x128xf32> to vector<32x32xf32>
    %cst_37 = arith.constant dense<0.000000e+00> : vector<32x32xf32>
    %72 = tpu.matmul %69, %70, %cst_37 {dimension_numbers = #tpu.dot_dimension_numbers<[1], [1], [0], [0], [0, 0, 1, 0], [], []>} : vector<32x32xf32>, vector<32x32xf32>, vector<32x32xf32> -> vector<32x32xf32>
    %cst_38 = arith.constant 0.176776692 : f32
    %73 = vector.broadcast %cst_38 : f32 to vector<32x32xf32>
    %74 = arith.mulf %72, %73 : vector<32x32xf32>
    %cst_39 = arith.constant dense<0xFF800000> : vector<32xf32>
    %75 = vector.multi_reduction <maximumf>, %74, %cst_39 [1] : vector<32x32xf32> to vector<32xf32>
    %76 = vector.shape_cast %75 : vector<32xf32> to vector<32x1xf32>
    %77 = vector.broadcast %76 : vector<32x1xf32> to vector<32x32xf32>
    %78 = arith.subf %74, %77 : vector<32x32xf32>
    %79 = math.exp %78 : vector<32x32xf32>
    %cst_40 = arith.constant dense<0.000000e+00> : vector<32xf32>
    %80 = vector.multi_reduction <add>, %79, %cst_40 [1] : vector<32x32xf32> to vector<32xf32>
    %81 = vector.shape_cast %80 : vector<32xf32> to vector<32x1xf32>
    %82 = vector.broadcast %81 : vector<32x1xf32> to vector<32x32xf32>
    %83 = arith.divf %79, %82 : vector<32x32xf32>
    %cst_41 = arith.constant dense<0.000000e+00> : vector<32x32xf32>
    %84 = tpu.matmul %83, %71, %cst_41 {dimension_numbers = #tpu.dot_dimension_numbers<[1], [0], [0], [1], [0, 0, 1, 1], [], []>} : vector<32x32xf32>, vector<32x32xf32>, vector<32x32xf32> -> vector<32x32xf32>
    %85 = tpu.concatenate %36, %52, %68, %84 in 1 : vector<32x32xf32>, vector<32x32xf32>, vector<32x32xf32>, vector<32x32xf32> -> vector<32x128xf32>
    %c0_42 = arith.constant 0 : index
    %c0_43 = arith.constant 0 : index
    %86 = vector.load %arg10[%c0_42, %c0_43] : memref<128x128xf32, #tpu.memory_space<vmem>>, vector<128x128xf32>
    %cst_44 = arith.constant dense<0.000000e+00> : vector<32x128xf32>
    %87 = tpu.matmul %85, %86, %cst_44 {dimension_numbers = #tpu.dot_dimension_numbers<[1], [0], [0], [1], [0, 0, 1, 1], [], []>} : vector<32x128xf32>, vector<128x128xf32>, vector<32x128xf32> -> vector<32x128xf32>
    %c0_45 = arith.constant 0 : index
    %c0_46 = arith.constant 0 : index
    %88 = vector.load %arg11[%c0_45, %c0_46] : memref<1x128xf32, #tpu.memory_space<vmem>>, vector<1x128xf32>
    %89 = vector.broadcast %88 : vector<1x128xf32> to vector<32x128xf32>
    %90 = arith.addf %87, %89 : vector<32x128xf32>
    %c0_47 = arith.constant 0 : index
    %c0_48 = arith.constant 0 : index
    %c0_49 = arith.constant 0 : index
    %91 = vector.load %arg12[%c0_47, %c0_48, %c0_49] : memref<1x32x128xf32, #tpu.memory_space<vmem>>, vector<1x32x128xf32>
    %92 = vector.shape_cast %91 : vector<1x32x128xf32> to vector<32x128xf32>
    %93 = vector.shape_cast %90 : vector<32x128xf32> to vector<1x32x128xf32>
    tpu.vector_store %arg12[%c0_47, %c0_48, %c0_49], %93 {strides = array<i32>} : memref<1x32x128xf32, #tpu.memory_space<vmem>>, vector<1x32x128xf32>,
    return
  }
  func.func @transform_0(%arg0: i32) -> (i32, i32, i32) {
    %c0_i32 = arith.constant 0 : i32
    %c0_i32_0 = arith.constant 0 : i32
    %c0_i32_1 = arith.constant 0 : i32
    return %arg0, %c0_i32, %c0_i32_0 : i32, i32, i32
  }
  func.func @transform_1(%arg0: i32) -> (i32, i32, i32) {
    %c0_i32 = arith.constant 0 : i32
    %c0_i32_0 = arith.constant 0 : i32
    %c0_i32_1 = arith.constant 0 : i32
    return %arg0, %c0_i32, %c0_i32_0 : i32, i32, i32
  }
  func.func @transform_2(%arg0: i32) -> (i32, i32, i32) {
    %c0_i32 = arith.constant 0 : i32
    %c0_i32_0 = arith.constant 0 : i32
    %c0_i32_1 = arith.constant 0 : i32
    return %arg0, %c0_i32, %c0_i32_0 : i32, i32, i32
  }
  func.func @transform_3(%arg0: i32) -> (i32, i32) {
    %c0_i32 = arith.constant 0 : i32
    %c0_i32_0 = arith.constant 0 : i32
    %c0_i32_1 = arith.constant 0 : i32
    return %c0_i32, %c0_i32_0 : i32, i32
  }
  func.func @transform_4(%arg0: i32) -> (i32, i32) {
    %c0_i32 = arith.constant 0 : i32
    %c0_i32_0 = arith.constant 0 : i32
    %c0_i32_1 = arith.constant 0 : i32
    return %c0_i32, %c0_i32_0 : i32, i32
  }
  func.func @transform_5(%arg0: i32) -> (i32, i32) {
    %c0_i32 = arith.constant 0 : i32
    %c0_i32_0 = arith.constant 0 : i32
    %c0_i32_1 = arith.constant 0 : i32
    return %c0_i32, %c0_i32_0 : i32, i32
  }
  func.func @transform_6(%arg0: i32) -> (i32, i32) {
    %c0_i32 = arith.constant 0 : i32
    %c0_i32_0 = arith.constant 0 : i32
    %c0_i32_1 = arith.constant 0 : i32
    return %c0_i32, %c0_i32_0 : i32, i32
  }
  func.func @transform_7(%arg0: i32) -> (i32, i32) {
    %c0_i32 = arith.constant 0 : i32
    %c0_i32_0 = arith.constant 0 : i32
    %c0_i32_1 = arith.constant 0 : i32
    return %c0_i32, %c0_i32_0 : i32, i32
  }
  func.func @transform_8(%arg0: i32) -> (i32, i32) {
    %c0_i32 = arith.constant 0 : i32
    %c0_i32_0 = arith.constant 0 : i32
    %c0_i32_1 = arith.constant 0 : i32
    return %c0_i32, %c0_i32_0 : i32, i32
  }
  func.func @transform_9(%arg0: i32) -> (i32, i32) {
    %c0_i32 = arith.constant 0 : i32
    %c0_i32_0 = arith.constant 0 : i32
    %c0_i32_1 = arith.constant 0 : i32
    return %c0_i32, %c0_i32_0 : i32, i32
  }
  func.func @transform_10(%arg0: i32) -> (i32, i32) {
    %c0_i32 = arith.constant 0 : i32
    %c0_i32_0 = arith.constant 0 : i32
    %c0_i32_1 = arith.constant 0 : i32
    return %c0_i32, %c0_i32_0 : i32, i32
  }
  func.func @transform_11(%arg0: i32) -> (i32, i32, i32) {
    %c0_i32 = arith.constant 0 : i32
    %c0_i32_0 = arith.constant 0 : i32
    %c0_i32_1 = arith.constant 0 : i32
    return %arg0, %c0_i32, %c0_i32_0 : i32, i32, i32
  }
}

</mosaic_0001>

<bundles_post_ra>
// kernel: tpu_custom_call.1
= control target key start
LH: loop header
LB: loop body
LE: loop exit
PB: predicated region body
PF: predicated region fallthrough
CT: control target
= control target key end

     0   :  { %s3115_s0 = inlined_call_operand.hbm [shape: f32[2,32,128], index: 0, kind: input, shape index: {}]   ;;  %s3116_s1 = inlined_call_operand.hbm [shape: f32[2,32,128], index: 1, kind: input, shape index: {}]   ;;  %s3117_s2 = inlined_call_operand.hbm [shape: f32[2,32,128], index: 2, kind: input, shape index: {}]   ;;  %s3118_s3 = inlined_call_operand.hbm [shape: f32[128,128], index: 3, kind: input, shape index: {}]   ;;  %s3119_s4 = inlined_call_operand.vmem [shape: f32[1,128], index: 4, kind: input, shape index: {}]   ;;  %s3120_s5 = inlined_call_operand.hbm [shape: f32[128,128], index: 5, kind: input, shape index: {}]   ;;  %s3121_s6 = inlined_call_operand.vmem [shape: f32[1,128], index: 6, kind: input, shape index: {}]   ;;  %s3122_s7 = inlined_call_operand.hbm [shape: f32[128,128], index: 7, kind: input, shape index: {}]   ;;  %s3123_s8 = inlined_call_operand.vmem [shape: f32[1,128], index: 8, kind: input, shape index: {}]   ;;  %s3124_s9 = inlined_call_operand.hbm [shape: f32[128,128], index: 9, kind: input, shape index: {}]   ;;  %s3125_s10 = inlined_call_operand.vmem [shape: f32[1,128], index: 10, kind: input, shape index: {}]   ;;  %s3126_s11 = inlined_call_operand.hbm [shape: f32[2,32,128], index: 11, kind: output, shape index: {}]  }
   0x1   :  { %3139 = sst [smem:[#allocation25_spill]] %s3116_s1 }
   0x2   :  { %3140 = sst [smem:[#allocation26_spill]] %s3118_s3 }
   0x3   :  { %3141 = sst [smem:[#allocation27_spill]] %s3120_s5 }
   0x4   :  { %3142 = sst [smem:[#allocation28_spill]] %s3122_s7 }
   0x5   :  { %3143 = sst [smem:[#allocation29_spill]] %s3124_s9 }
   0x6   :  { %3144 = sst [smem:[#allocation30_spill]] %s3126_s11 }
   0x7   :  { %16 = vsyncpa [#allocation3], 0 }
   0x8   :  { %18 = vsyncpa [#allocation3 + $0x1], 0 }
   0x9   :  { %19 = vsyncpa [#allocation6], 0 }
   0xa   :  { %21 = vsyncpa [#allocation6 + $0x1], 0 }
   0xb   :  { %22 = vsyncpa [#allocation9], 0 }
   0xc   :  { %23 = vsyncpa [#allocation12], 0 }
   0xd   :  { %24 = vsyncpa [#allocation4], 0 }
   0xe   :  { %26 = vsyncpa [#allocation4 + $0x1], 0  ;;  %s2489_s17 = smov 0   ;;  %s2491_s18 = smov 0  }
   0xf   :  { %s2493_s19 = smov 0   ;;  %s2495_s20 = smov 0  }
  0x10 LB: > { %3145 = sst [smem:[#allocation20_spill]] %s2404_s17  ;;  %s2510_s21 = sadd.s32 4294967295, %s2416_s20   ;;  %s2416_s20 = sphi %s2495_s20, %s3175_s20   ;;  %s2412_s19 = sphi %s2493_s19, %s3179_s19   ;;  %s2408_s18 = sphi %s2491_s18, %s3178_s18   ;;  %s2404_s17 = sphi %s2489_s17, %s3177_s17  }
  0x11   : > { %3146 = sst [smem:[#allocation21_spill]] %s2416_s20  ;;  %s1839_s22 = sadd.s32 4294967294, %s2416_s20  }
  0x12   : > { %p52_p0 = scmp.ne.s32.totalorder %s2408_s18, %s2404_s17  ;;  %p3137_p1 = scmp.eq.s32.totalorder %s2510_s21, 0 }
  0x13   : > { %p296_p2 = scmp.eq.s32.totalorder %s2510_s21, 1  ;;  %p302_p3 = scmp.eq.s32.totalorder %s1839_s22, 1 }
  0x14   : > { %p2519_p4 = por %p3137_p1, %p52_p0  ;;  %p1840_p5 = scmp.ge.s32.totalorder %s2416_s20, 1 }
  0x15   : > { %p2524_p6 = por %p302_p3, %p52_p0  ;;  %p309_p7 = scmp.lt.s32.totalorder %s2416_s20, 3 }
  0x16   : > { %s3150_s3 = sld [smem:[#allocation26_spill]]  ;;  %s2418_s29 = smov [#allocation8]  }
  0x17   : > { %s3148_s24 = scalar_select %p2524_p6, 1, 0 }
  0x18   : > { %p2532_p8 = pnand %p1840_p5, %p309_p7  ;;  %s322_s30 = sshll.u32 %s2418_s29, 4  ;;  %s323_s30 = int_to_ptr.vmem [resolvable:$true] %s322_s30 }
  0x19   : > { %3149 = sst [smem:[#allocation22_spill]] %s3148_s24  ;;  %s3127_s16 = smov 128  }
  0x1a   : > { %p1945_p9 = pneg %p2532_p8  ;;  %s3153_s7 = sld [smem:[#allocation28_spill]] }
  0x1b   : > { %s3129_s22 = smov 8   ;;  %s2421_s25 = smov [#allocation11]  }
  0x1c   : > { %s320_s27 = sshll.u32 %s3150_s3, 4  ;;  %p2540_p10 = pnand %p1945_p9, %p3137_p1  ;;  %s321_s27 = int_to_ptr.hbm [resolvable:$true] %s320_s27 }
  0x1d   : > { %s356_s26 = sshll.u32 %s2421_s25, 4  ;;  %s2559_s29 = sadd.s32 1, %s2416_s20   ;;  %s357_s26 = int_to_ptr.vmem [resolvable:$true] %s356_s26 }
  0x1e   : > { %1948 = dma.hbm_to_vmem [thread:$0]  (!%p2540_p10), %s321_s27, 2048, %s323_s30, [#allocation9], %s3127_s16, %s3127_s16, %s3129_s22  }
  0x1f   : > { %3154 = sst [smem:[#allocation23_spill]] %s2559_s29  ;;  %s39_s13 = sadd.s32 1, %s2412_s19 }
  0x20   : > { %s354_s15 = sshll.u32 %s3153_s7, 4  ;;  %s36_s14 = ssub.s32 %s2416_s20, %s2559_s29  ;;  %s355_s15 = int_to_ptr.hbm [resolvable:$true] %s354_s15 }
  0x21   : > { %1954 = dma.hbm_to_vmem [thread:$0]  (!%p2540_p10), %s355_s15, 2048, %s357_s26, [#allocation12], %s3127_s16, %s3127_s16, %s3129_s22  }
  0x22   : > { %p46_p12 = scmp.ne.s32.totalorder %s2412_s19, %s2408_s18  ;;  %p37_p13 = scmp.eq.s32.totalorder %s36_s14, 0 }
  0x23   : > { %p47_p0 = scmp.eq.s32.totalorder %s2416_s20, 0  ;;  %p1976_p5 = scmp.lt.s32.totalorder %s2416_s20, 2 }
  0x24   : > { %p2569_p3 = por %p296_p2, %p46_p12  ;;  %s3133_s25 = sand.u32 1, %s2412_s19  }
  0x25   : > { %s2575_s30 = scalar_select %p37_p13, %s2412_s19, %s39_s13  }
  0x26   : > { %p48_p7 = por %p47_p0, %p46_p12  ;;  %s2580_s15 = sshll.u32 %s3133_s25, 5 }
  0x27   : > { %3156 = sst [smem:[#allocation24_spill]] %s2575_s30  ;;  %s2583_s26 = sshll.u32 %s2416_s20, 5 }
  0x28   : > { %p2585_p9 = pnand %p1976_p5, %p48_p7  ;;  %s412_s16 = sand.u32 1, %s2416_s20  }
  0x29   : > { %s3158_s1 = sld [smem:[#allocation25_spill]]  ;;  %s416_s30 = scalar_lea.vmem [#allocation5], %s2580_s15 }
  0x2a   : > { %s424_s29 = sshll.u32 %s416_s30, 4  ;;  %s2595_s25 = scalar_lea.sflag [#allocation6], %s412_s16  ;;  %s425_s29 = int_to_ptr.vmem [resolvable:$true] %s424_s29 }
  0x2b   : > { %p2192_p12 = pneg %p2585_p9 }
  0x2f   : > { %s421_s13 = scalar_lea.hbm %s3158_s1, %s2583_s26  ;;  %s2195_s22 = scalar_lea.hbm %s3158_s1, 64 }
  0x30   : > { %s422_s7 = sshll.u32 %s421_s13, 4  ;;  %s423_s7 = int_to_ptr.hbm [resolvable:$true] %s422_s7 }
  0x31   : > { %s2188_s24 = sshra.s32 %s423_s7, 4  ;;  %s2189_s24 = int_to_ptr.hbm [resolvable:$true] %s2188_s24 }
  0x32   : > { %s2190_s17 = scalar_lea.hbm %s2189_s24, 32  ;;  %p2196_p5 = scmp.lt.s32.totalorder %s2189_s24, %s3158_s1 }
  0x33   : > { %p2191_p2 = scmp.ne.s32.totalorder %s2189_s24, %s2190_s17  ;;  %p2197_p7 = scmp.lt.s32.totalorder %s2195_s22, %s2190_s17 }
  0x35   : > { %p2193_p13 = pnand %p2192_p12, %p2191_p2  ;;  %p2198_p11 = por %p2197_p7, %p2196_p5 }
  0x37   : > { %p2194_p0 = pneg %p2193_p13 }
  0x39   : > { %p2199_p1 = pnand %p2198_p11, %p2194_p0 }
  0x3b   : > { %2202 = shalt.err (!%p2199_p1)
}
  0x3c   : > { %s3159_s16 = smov 8   ;;  %s3160_s11 = smov 128  }
  0x3d   : > { %1964 = dma.hbm_to_vmem [thread:$0]  (!%p2585_p9), %s423_s7, 512, %s425_s29, %s2595_s25, %s3160_s11, %s3160_s11, %s3159_s16  }
  0x3e   : > { %s3161_s5 = sld [smem:[#allocation27_spill]]  ;;  %s2422_s17 = smov [#allocation10]  }
  0x3f   : > { %s339_s24 = sshll.u32 %s2422_s17, 4  ;;  %s3162_s9 = sld [smem:[#allocation29_spill]]  ;;  %s340_s24 = int_to_ptr.vmem [resolvable:$true] %s339_s24 }
  0x40   : > { %s2423_s7 = smov [#allocation13]   ;;  %s399_s17 = scalar_lea.hbm %s3115_s0, %s2583_s26 }
  0x41   : > { %s373_s29 = sshll.u32 %s2423_s7, 4  ;;  %s394_s22 = scalar_lea.vmem [#allocation2], %s2580_s15  ;;  %s374_s29 = int_to_ptr.vmem [resolvable:$true] %s373_s29 }
  0x42   : > { %s402_s30 = sshll.u32 %s394_s22, 4  ;;  %s403_s30 = int_to_ptr.vmem [resolvable:$true] %s402_s30 }
  0x44   : > { %s337_s13 = sshll.u32 %s3161_s5, 4  ;;  %s400_s5 = sshll.u32 %s399_s17, 4  ;;  %s338_s13 = int_to_ptr.hbm [resolvable:$true] %s337_s13  ;;  %s401_s5 = int_to_ptr.hbm [resolvable:$true] %s400_s5 }
  0x45   : > { %s371_s1 = sshll.u32 %s3162_s9, 4  ;;  %s2278_s9 = sshra.s32 %s401_s5, 4  ;;  %s372_s1 = int_to_ptr.hbm [resolvable:$true] %s371_s1  ;;  %s2279_s9 = int_to_ptr.hbm [resolvable:$true] %s2278_s9 }
  0x46   : > { %1951 = dma.hbm_to_vmem [thread:$0]  (!%p2540_p10), %s338_s13, 2048, %s340_s24, [#allocation9], %s3160_s11, %s3160_s11, %s3159_s16  }
  0x47   : > { %1957 = dma.hbm_to_vmem [thread:$0]  (!%p2540_p10), %s372_s1, 2048, %s374_s29, [#allocation12], %s3160_s11, %s3160_s11, %s3159_s16  }
  0x48   : > { %s3163_s13 = sand.u32 1, %s2412_s19   ;;  %s2280_s7 = scalar_lea.hbm %s2279_s9, 32 }
  0x49   : > { %s391_s24 = scalar_lea.sflag [#allocation3], %s3163_s13  ;;  %p2281_p1 = scmp.ne.s32.totalorder %s2279_s9, %s2280_s7 }
  0x4a   : > { %s2285_s29 = scalar_lea.hbm %s3115_s0, 64  ;;  %p2286_p10 = scmp.lt.s32.totalorder %s2279_s9, %s3115_s0 }
  0x4b   : > { %p2283_p11 = pnand %p2281_p1, %p2192_p12  ;;  %p2287_p13 = scmp.lt.s32.totalorder %s2285_s29, %s2280_s7 }
  0x4d   : > { %p2284_p2 = pneg %p2283_p11  ;;  %p2288_p0 = por %p2287_p13, %p2286_p10 }
  0x4f   : > { %p2289_p5 = pnand %p2288_p0, %p2284_p2 }
  0x51   : > { %2292 = shalt.err (!%p2289_p5)
}
  0x52   : > { %1961 = dma.hbm_to_vmem [thread:$0]  (!%p2585_p9), %s401_s5, 512, %s403_s30, %s391_s24, %s3160_s11, %s3160_s11, %s3159_s16  }
  0x53   : > { %s443_s13 = scalar_lea.hbm %s3117_s2, %s2583_s26  ;;  %s438_s1 = scalar_lea.vmem [#allocation7], %s2580_s15 }
  0x54   : > { %s446_s12 = sshll.u32 %s438_s1, 4  ;;  %s444_s9 = sshll.u32 %s443_s13, 4  ;;  %s447_s12 = int_to_ptr.vmem [resolvable:$true] %s446_s12  ;;  %s445_s9 = int_to_ptr.hbm [resolvable:$true] %s444_s9 }
  0x55   : > { %s2308_s7 = sshra.s32 %s445_s9, 4  ;;  %s2315_s5 = scalar_lea.hbm %s3117_s2, 64  ;;  %s2309_s7 = int_to_ptr.hbm [resolvable:$true] %s2308_s7 }
  0x56   : > { %s2310_s29 = scalar_lea.hbm %s2309_s7, 32  ;;  %p2316_p2 = scmp.lt.s32.totalorder %s2309_s7, %s3117_s2 }
  0x57   : > { %p2311_p7 = scmp.ne.s32.totalorder %s2309_s7, %s2310_s29  ;;  %p2317_p10 = scmp.lt.s32.totalorder %s2315_s5, %s2310_s29 }
  0x59   : > { %p2313_p1 = pnand %p2311_p7, %p2192_p12  ;;  %p2318_p13 = por %p2317_p10, %p2316_p2 }
  0x5b   : > { %p2314_p11 = pneg %p2313_p1 }
  0x5d   : > { %p2319_p0 = pnand %p2318_p13, %p2314_p11 }
  0x5f   : > { %2322 = shalt.err (!%p2319_p0)
}
  0x60   : > { %1967 = dma.hbm_to_vmem [thread:$0]  (!%p2585_p9), %s445_s9, 512, %s447_s12, %s2595_s25, %s3160_s11, %s3160_s11, %s3159_s16  }
  0x61   : > { %458 = sbr.rel (%p2532_p8) target bundleno = 1330 (0x532), region = 64  ;;  %s2674_s15 = sand.u32 (!%p2532_p8), 1, %s2408_s18  }
  0x62   : > { %s2677_s26 = sshll.u32 (!%p2532_p8), %s2674_s15, 5  ;;  %s461_s17 = scalar_lea.sflag (!%p2532_p8), [#allocation3], %s2674_s15 }
  0x63   : > { %s2681_s22 = scalar_lea.vmem (!%p2532_p8), [#allocation2], %s2677_s26 }
  0x66   : > { %2383 = dma.done.wait (%p2519_p4), %s461_s17, 512  }
  0x67   : > { %2385 = vsyncadd (%p2519_p4), %s461_s17, 4294966784  ;;  %s470_s11 = sand.u32 1, %s2510_s21   ;;  %s2689_s25 = scalar_lea.vmem [#allocation5], %s2677_s26 }
  0x68   : > { %s471_s28 = scalar_lea.sflag [#allocation6], %s470_s11 }
  0x69   : > { %2387 = dma.done.wait (%p2519_p4), %s471_s28, 1024  }
  0x6a   : > { %2389 = vsyncadd (%p2519_p4), %s471_s28, 4294966272  ;;  %s2696_s14 = scalar_lea.vmem [#allocation7], %s2677_s26  ;;  %p3164_p8 = scmp.eq.s32.totalorder %s2510_s21, 0 }
  0x6c   : > { %2391 = dma.done.wait (%p3164_p8), [#allocation9], 4096   ;;  %p3165_p9 = pmov %p3164_p8 }
  0x6d   : > { %p3166_p12 = pmov %p3164_p8 }
  0x6e   : > { %2393 = vsyncadd (%p3165_p9), [#allocation9], 4294963200 }
  0x6f   : > { %2395 = dma.done.wait (%p3166_p12), [#allocation12], 4096   ;;  %p3167_p5 = pmov %p3164_p8 }
  0x70   : > { %v630_v0 = vld [vmem:[#allocation10 + $0x78] sm:$0xff]  ;;  %v629_v1 = vld [vmem:[#allocation10 + $0x70] sm:$0xff]  ;;  %v628_v2 = vld [vmem:[#allocation10 + $0x68] sm:$0xff]  ;;  %s2424_s13 = smov 96   ;;  %vm713_vm0 = vcmask 261120   ;;  %s2425_s9 = smov 64  }
  0x71   : > { %2397 = vsyncadd (%p3167_p5), [#allocation12], 4294963200  ;;  %635 = vmatpush.msra.mxu1 %v630_v0  ;;  %v581_v3 = vld [vmem:[#allocation8 + $0x78] sm:$0xff]  ;;  %v580_v4 = vld [vmem:[#allocation8 + $0x70] sm:$0xff]  ;;  %s2426_s7 = smov 32   ;;  %s553_s30 = scalar_lea.vmem [#allocation14], %s2677_s26 }
  0x72   : > { %586 = vmatpush.msra.mxu0 %v581_v3  ;;  %v627_v5 = vld [vmem:[#allocation10 + $0x60] sm:$0xff]  ;;  %v579_v6 = vld [vmem:[#allocation8 + $0x68] sm:$0xff]  ;;  %v626_v7 = vld [vmem:[#allocation10 + $0x58] sm:$0xff]  ;;  %s1920_s24 = sshll.u32 %s2510_s21, 5  ;;  %s3170_s11 = sld [smem:[#allocation30_spill]] }
  0x73   : > { %636 = vmatpush.msra.mxu1 %v629_v1  ;;  %v578_v8 = vld [vmem:[#allocation8 + $0x60] sm:$0xff]  ;;  %v625_v9 = vld [vmem:[#allocation10 + $0x50] sm:$0xff]  ;;  %v577_v10 = vld [vmem:[#allocation8 + $0x58] sm:$0xff]  ;;  %s1670_s26 = scalar_lea.sflag [#allocation4], %s2674_s15 }
  0x74   : > { %587 = vmatpush.msra.mxu0 %v580_v4  ;;  %v624_v11 = vld [vmem:[#allocation10 + $0x48] sm:$0xff]  ;;  %v576_v12 = vld [vmem:[#allocation8 + $0x50] sm:$0xff]  ;;  %v623_v13 = vld [vmem:[#allocation10 + $0x40] sm:$0xff] }
  0x75   : > { %637 = vmatpush.msra.mxu1 %v628_v2  ;;  %v575_v14 = vld [vmem:[#allocation8 + $0x48] sm:$0xff]  ;;  %v622_v15 = vld [vmem:[#allocation10 + $0x38] sm:$0xff]  ;;  %v574_v16 = vld [vmem:[#allocation8 + $0x40] sm:$0xff] }
  0x76   : > { %588 = vmatpush.msra.mxu0 %v579_v6  ;;  %v621_v17 = vld [vmem:[#allocation10 + $0x30] sm:$0xff]  ;;  %v573_v18 = vld [vmem:[#allocation8 + $0x38] sm:$0xff]  ;;  %v620_v19 = vld [vmem:[#allocation10 + $0x28] sm:$0xff] }
  0x77   : > { %638 = vmatpush.msra.mxu1 %v627_v5  ;;  %v572_v20 = vld [vmem:[#allocation8 + $0x30] sm:$0xff]  ;;  %v619_v21 = vld [vmem:[#allocation10 + $0x20] sm:$0xff]  ;;  %v571_v22 = vld [vmem:[#allocation8 + $0x28] sm:$0xff] }
  0x78   : > { %589 = vmatpush.msra.mxu0 %v578_v8  ;;  %v618_v23 = vld [vmem:[#allocation10 + $0x18] sm:$0xff]  ;;  %v570_v24 = vld [vmem:[#allocation8 + $0x20] sm:$0xff]  ;;  %v617_v25 = vld [vmem:[#allocation10 + $0x10] sm:$0xff]  ;;  %s1681_s28 = scalar_lea.hbm %s3170_s11, %s1920_s24  ;;  %s2358_s1 = scalar_lea.hbm %s3170_s11, 64 }
  0x79   : > { %639 = vmatpush.msra.mxu1 %v626_v7  ;;  %v569_v26 = vld [vmem:[#allocation8 + $0x18] sm:$0xff]  ;;  %v616_v27 = vld [vmem:[#allocation10 + $0x8] sm:$0xff]  ;;  %v568_v28 = vld [vmem:[#allocation8 + $0x10] sm:$0xff] }
  0x7a   : > { %590 = vmatpush.msra.mxu0 %v577_v10  ;;  %v679_v29 = vld [vmem:[#allocation11 + $0x78] sm:$0xff]  ;;  %v678_v30 = vld [vmem:[#allocation11 + $0x70] sm:$0xff]  ;;  %v615_v31 = vld [vmem:[#allocation10] sm:$0xff] }
  0x7b   : > { %640 = vmatpush.msra.mxu1 %v625_v9  ;;  %v567_v32 = vld [vmem:[#allocation8 + $0x8] sm:$0xff]  ;;  %684 = vmatpush.msra.mxu2 %v679_v29  ;;  %v558_v33 = vld [vmem:[%s2689_s25] sm:$0xff]  ;;  %v675_v38 = vld [vmem:[#allocation11 + $0x58] sm:$0xff] }
  0x7c   : > { %591 = vmatpush.msra.mxu0 %v576_v12  ;;  %v677_v34 = vld [vmem:[#allocation11 + $0x68] sm:$0xff]  ;;  %v566_v35 = vld [vmem:[#allocation8] sm:$0xff]  ;;  %v674_v39 = vld [vmem:[#allocation11 + $0x50] sm:$0xff] }
  0x7d   : > { %641 = vmatpush.msra.mxu1 %v624_v11  ;;  %685 = vmatpush.msra.mxu2 %v678_v30  ;;  %v554_v36 = vld [vmem:[%s2681_s22] sm:$0xff]  ;;  %v559_v40 = vld [vmem:[%s2689_s25 + $0x8] sm:$0xff]  ;;  %v671_v44 = vld [vmem:[#allocation11 + $0x38] sm:$0xff] }
  0x7e   : > { %592 = vmatpush.msra.mxu0 %v575_v14  ;;  %v676_v37 = vld [vmem:[#allocation11 + $0x60] sm:$0xff]  ;;  %v673_v41 = vld [vmem:[#allocation11 + $0x48] sm:$0xff]  ;;  %v670_v45 = vld [vmem:[#allocation11 + $0x30] sm:$0xff] }
  0x7f   : > { %642 = vmatpush.msra.mxu1 %v623_v13  ;;  %686 = vmatpush.msra.mxu2 %v677_v34  ;;  %v555_v42 = vld [vmem:[%s2681_s22 + $0x8] sm:$0xff]  ;;  %v672_v43 = vld [vmem:[#allocation11 + $0x40] sm:$0xff]  ;;  %v560_v46 = vld [vmem:[%s2689_s25 + $0x10] sm:$0xff] }
  0x80   : > { %593 = vmatpush.msra.mxu0 %v574_v16  ;;  %v669_v47 = vld [vmem:[#allocation11 + $0x28] sm:$0xff]  ;;  %v556_v48 = vld [vmem:[%s2681_s22 + $0x10] sm:$0xff]  ;;  %v668_v49 = vld [vmem:[#allocation11 + $0x20] sm:$0xff] }
  0x81   : > { %643 = vmatpush.msra.mxu1 %v622_v15  ;;  %687 = vmatpush.msra.mxu2 %v676_v37  ;;  %v667_v50 = vld [vmem:[#allocation11 + $0x18] sm:$0xff]  ;;  %v666_v51 = vld [vmem:[#allocation11 + $0x10] sm:$0xff]  ;;  %v665_v53 = vld [vmem:[#allocation11 + $0x8] sm:$0xff] }
  0x82   : > { %594 = vmatpush.msra.mxu0 %v573_v18  ;;  %v561_v52 = vld [vmem:[%s2689_s25 + $0x18] sm:$0xff]  ;;  %v664_v55 = vld [vmem:[#allocation11] sm:$0xff]  ;;  %v563_v57 = vld [vmem:[%s2696_s14 + $0x8] sm:$0xff]  ;;  %s1682_s25 = sshll.u32 %s553_s30, 4  ;;  %s1683_s25 = int_to_ptr.vmem [resolvable:$true] %s1682_s25 }
  0x83   : > { %644 = vmatpush.msra.mxu1 %v621_v17  ;;  %688 = vmatpush.msra.mxu2 %v675_v38  ;;  %v557_v54 = vld [vmem:[%s2681_s22 + $0x18] sm:$0xff]  ;;  %v562_v56 = vld [vmem:[%s2696_s14] sm:$0xff]  ;;  %v564_v58 = vld [vmem:[%s2696_s14 + $0x10] sm:$0xff] }
  0x84   : > { %595 = vmatpush.msra.mxu0 %v572_v20  ;;  %v565_v59 = vld [vmem:[%s2696_s14 + $0x18] sm:$0xff]  ;;  %v2061_v60 = vld [vmem:[%s3119_s4] ss:$0 sm:$0xff]  ;;  %s1684_s14 = sshll.u32 %s1681_s28, 4  ;;  %s1685_s14 = int_to_ptr.hbm [resolvable:$true] %s1684_s14 }
  0x85   : > { %645 = vmatpush.msra.mxu1 %v620_v19  ;;  %689 = vmatpush.msra.mxu2 %v674_v39  ;;  %v2060_v0 = vld [vmem:[%s3121_s6] ss:$0 sm:$0xff]  ;;  %s2352_s23 = sshra.s32 %s1685_s14, 4  ;;  %s2353_s23 = int_to_ptr.hbm [resolvable:$true] %s2352_s23 }
  0x86   : > { %596 = vmatpush.msra.mxu0 %v571_v22  ;;  %v2062_v17 = vld [vmem:[%s3123_s8] ss:$0 sm:$0xff]  ;;  %s2354_s16 = scalar_lea.hbm %s2353_s23, 32  ;;  %p2359_p11 = scmp.lt.s32.totalorder %s2353_s23, %s3170_s11 }
  0x87   : > { %646 = vmatpush.msra.mxu1 %v619_v21  ;;  %690 = vmatpush.msra.mxu2 %v673_v41  ;;  %p2355_p4 = scmp.ne.s32.totalorder %s2353_s23, %s2354_s16  ;;  %p2360_p2 = scmp.lt.s32.totalorder %s2358_s1, %s2354_s16 }
  0x88   : > { %597 = vmatpush.msra.mxu0 %v570_v24 }
  0x89   : > { %647 = vmatpush.msra.mxu1 %v618_v23  ;;  %691 = vmatpush.msra.mxu2 %v672_v43  ;;  %p2356_p7 = pnand %p2355_p4, %p2569_p3  ;;  %p2361_p10 = por %p2360_p2, %p2359_p11 }
  0x8a   : > { %598 = vmatpush.msra.mxu0 %v569_v26 }
  0x8b   : > { %648 = vmatpush.msra.mxu1 %v617_v25  ;;  %692 = vmatpush.msra.mxu2 %v671_v44  ;;  %p2357_p1 = pneg %p2356_p7 }
  0x8c   : > { %599 = vmatpush.msra.mxu0 %v568_v28 }
  0x8d   : > { %649 = vmatpush.msra.mxu1 %v616_v27  ;;  %693 = vmatpush.msra.mxu2 %v670_v45  ;;  %p2362_p13 = pnand %p2361_p10, %p2357_p1 }
  0x8e   : > { %600 = vmatpush.msra.mxu0 %v567_v32 }
  0x8f   : > { %650 = vmatpush.msra.mxu1 %v615_v31  ;;  %694 = vmatpush.msra.mxu2 %v669_v47 }
  0x90   : > { %651 = vmatmul.f32.vlgmr.msra.gmra.mxu1 %v558_v33  ;;  %601 = vmatpush.msra.mxu0 %v566_v35 }
  0x91   : > { %602 = vmatmul.f32.vlgmr.msra.gmra.mxu0 %v554_v36  ;;  %695 = vmatpush.msra.mxu2 %v668_v49 }
  0x93   : > { %696 = vmatpush.msra.mxu2 %v667_v50 }
  0x95   : > { %697 = vmatpush.msra.mxu2 %v666_v51 }
  0x97   : > { %698 = vmatpush.msra.mxu2 %v665_v53 }
  0x98   : > { %654 = vmatmul.f32.gmra.mxu1 %v559_v40 }
  0x99   : > { %605 = vmatmul.f32.gmra.mxu0 %v555_v42  ;;  %699 = vmatpush.msra.mxu2 %v664_v55 }
  0x9a   : > { %700 = vmatmul.f32.vlgmr.msra.gmra.mxu2 %v562_v56 }
  0xa0   : > { %657 = vmatmul.f32.gmra.mxu1 %v560_v46 }
  0xa1   : > { %608 = vmatmul.f32.gmra.mxu0 %v556_v48 }
  0xa2   : > { %703 = vmatmul.f32.gmra.mxu2 %v563_v57 }
  0xa8   : > { %660 = vmatmul.f32.gmra.mxu1 %v561_v52 }
  0xa9   : > { %611 = vmatmul.f32.gmra.mxu0 %v557_v54 }
  0xaa   : > { %706 = vmatmul.f32.gmra.mxu2 %v564_v58 }
  0xb2   : > { %709 = vmatmul.f32.gmra.mxu2 %v565_v59 }
 0x10d   : > { %v652_v61 = vpop.f32.mrf.mxu1 }
 0x10e   : > { %v603_v62 = vpop.f32.mrf.mxu0  ;;  %v653_v4 = vadd.f32 %v2060_v0, %v652_v61 }
 0x10f   : > { %v604_v63 = vadd.f32 %v2061_v60, %v603_v62 }
 0x111   : > { %908 = vrot.lane.b32.xlu2 %v604_v63, %s2424_s13 }
 0x115   : > { %v655_v1 = vpop.f32.mrf.mxu1 }
 0x116   : > { %v656_v2 = vadd.f32 %v2060_v0, %v655_v1  ;;  %v606_v7 = vpop.f32.mrf.mxu0 }
 0x117   : > { %v607_v10 = vadd.f32 %v2061_v60, %v606_v7 }
 0x118   : > { %918 = vrot.lane.b32.xlu1 %v656_v2, %s2424_s13 }
 0x11d   : > { %v658_v3 = vpop.f32.mrf.mxu1  ;;  %v701_v14 = vpop.f32.mrf.mxu2 }
 0x11e   : > { %v659_v8 = vadd.f32 %v2060_v0, %v658_v3  ;;  %v609_v9 = vpop.f32.mrf.mxu0  ;;  %v702_v21 = vadd.f32 %v2062_v17, %v701_v14 }
 0x11f   : > { %v610_v12 = vadd.f32 %v2061_v60, %v609_v9 }
 0x120   : > { %916 = vrot.lane.b32.xlu1 %v653_v4, %s2424_s13 }
 0x125   : > { %v661_v5 = vpop.f32.mrf.mxu1  ;;  %v704_v15 = vpop.f32.mrf.mxu2 }
 0x126   : > { %v662_v6 = vadd.f32 %v2060_v0, %v661_v5  ;;  %v612_v11 = vpop.f32.mrf.mxu0  ;;  %v705_v22 = vadd.f32 %v2062_v17, %v704_v15 }
 0x127   : > { %v613_v13 = vadd.f32 %v2061_v60, %v612_v11 }
 0x128   : > { %922 = vrot.lane.b32.xlu0 %v662_v6, %s2424_s13  ;;  %1864 = vmatpush.xpose.msk.msra.mxu3 %vm713_vm0, %v662_v6  ;;  %v2759_v23 = vpack.i.bf16 %v702_v21, %v705_v22 }
 0x129   : > { %1138 = vrot.lane.b32.xlu1 %v659_v8, %s2425_s9  ;;  %1140 = vrot.lane.b32.xlu2 %v662_v6, %s2425_s9 }
 0x12c   : > { %1865 = vmatpush.xpose.msk.msra.mxu3 %vm713_vm0, %v659_v8 }
 0x12d   : > { %v707_v16 = vpop.f32.mrf.mxu2 }
 0x12e   : > { %v708_v19 = vadd.f32 %v2062_v17, %v707_v16 }
 0x130   : > { %920 = vrot.lane.b32.xlu0 %v659_v8, %s2424_s13  ;;  %1866 = vmatpush.xpose.msk.msra.mxu3 %vm713_vm0, %v656_v2 }
 0x131   : > { %1134 = vrot.lane.b32.xlu1 %v653_v4, %s2425_s9  ;;  %1136 = vrot.lane.b32.xlu2 %v656_v2, %s2425_s9 }
 0x134   : > { %1867 = vmatpush.xpose.msk.msra.mxu3 %vm713_vm0, %v653_v4 }
 0x135   : > { %v710_v18 = vpop.f32.mrf.mxu2 }
 0x136   : > { %v711_v20 = vadd.f32 %v2062_v17, %v710_v18 }
 0x137   : > { %1868 = vmatmul.msk.f32.vlgmr.msra.gmra.mxu3 %vm713_vm0, %v604_v63 }
 0x138   : > { %910 = vrot.lane.b32.xlu0 %v607_v10, %s2424_s13  ;;  %891 = vmatpush.msrb.mxu3 %v711_v20  ;;  %v2763_v24 = vpack.i.bf16 %v708_v19, %v711_v20 }
 0x139   : > { %1352 = vrot.lane.b32.xlu1 %v659_v8, %s2426_s7  ;;  %1354 = vrot.lane.b32.xlu2 %v662_v6, %s2426_s7 }
 0x13a   : > { %892 = vmatpush.msrb.mxu3 %v708_v19 }
 0x13c   : > { %893 = vmatpush.msrb.mxu3 %v705_v22 }
 0x13e   : > { %894 = vmatpush.msrb.mxu3 %v702_v21 }
 0x13f   : > { %1869 = vmatmul.msk.f32.gmra.mxu3 %vm713_vm0, %v607_v10 }
 0x140   : > { %912 = vrot.lane.b32.xlu0 %v610_v12, %s2424_s13 }
 0x141   : > { %1128 = vrot.lane.b32.xlu1 %v607_v10, %s2425_s9  ;;  %914 = vrot.lane.b32.xlu2 %v613_v13, %s2424_s13 }
 0x147   : > { %1870 = vmatmul.msk.f32.gmra.mxu3 %vm713_vm0, %v610_v12 }
 0x148   : > { %1126 = vrot.lane.b32.xlu0 %v604_v63, %s2425_s9 }
 0x149   : > { %1130 = vrot.lane.b32.xlu1 %v610_v12, %s2425_s9  ;;  %1348 = vrot.lane.b32.xlu2 %v653_v4, %s2426_s7 }
 0x14f   : > { %1871 = vmatmul.msk.f32.gmra.mxu3 %vm713_vm0, %v613_v13 }
 0x150   : > { %1350 = vrot.lane.b32.xlu0 %v656_v2, %s2426_s7 }
 0x151   : > { %1344 = vrot.lane.b32.xlu1 %v610_v12, %s2426_s7  ;;  %1342 = vrot.lane.b32.xlu2 %v607_v10, %s2426_s7 }
 0x158   : > { %1340 = vrot.lane.b32.xlu0 %v604_v63, %s2426_s7 }
 0x159   : > { %1346 = vrot.lane.b32.xlu2 %v613_v13, %s2426_s7 }
 0x160   : > { %1132 = vrot.lane.b32.xlu0 %v613_v13, %s2425_s9 }
 0x161   : > { %2031 = vrot.lane.b32.xlu2 %v2763_v24, %s2424_s13 }
 0x168   : > { %2026 = vrot.lane.b32.xlu0 %v2759_v23, %s2424_s13 }
 0x16b   : > { %v909_v25 = vpop.permute.xlu2 %908 }
 0x170   : > { %2036 = vrot.lane.b32.xlu0 %v2763_v24, %s2425_s9 }
 0x183   : > { %v1141_v26 = vpop.permute.xlu2 %1140 }
 0x184   : > { %1888 = vmatpush.xpose.msk.msrb.mxu2 %vm713_vm0, %v1141_v26 }
 0x18a   : > { %v919_v27 = vpop.permute.xlu1 %918 }
 0x18b   : > { %v1137_v31 = vpop.permute.xlu2 %1136 }
 0x192   : > { %v917_v28 = vpop.permute.xlu1 %916 }
 0x193   : > { %v1355_v34 = vpop.permute.xlu2 %1354 }
 0x19a   : > { %v923_v29 = vpop.permute.xlu0 %922 }
 0x19b   : > { %v1139_v30 = vpop.permute.xlu1 %1138  ;;  %1876 = vmatpush.xpose.msk.msrb.mxu0 %vm713_vm0, %v923_v29  ;;  %v915_v38 = vpop.permute.xlu2 %914 }
 0x19c   : > { %1889 = vmatpush.xpose.msk.msrb.mxu2 %vm713_vm0, %v1139_v30 }
 0x1a0   : > { %1890 = vmatpush.xpose.msk.msrb.mxu2 %vm713_vm0, %v1137_v31 }
 0x1a2   : > { %v921_v32 = vpop.permute.xlu0 %920 }
 0x1a3   : > { %v1135_v33 = vpop.permute.xlu1 %1134  ;;  %1877 = vmatpush.xpose.msk.msrb.mxu0 %vm713_vm0, %v921_v32  ;;  %v1349_v43 = vpop.permute.xlu2 %1348 }
 0x1a4   : > { %1891 = vmatpush.xpose.msk.msrb.mxu2 %vm713_vm0, %v1135_v33 }
 0x1a7   : > { %1878 = vmatpush.xpose.msk.msrb.mxu0 %vm713_vm0, %v919_v27 }
 0x1aa   : > { %v911_v35 = vpop.permute.xlu0 %910 }
 0x1ab   : > { %1879 = vmatpush.xpose.msk.msrb.mxu0 %vm713_vm0, %v917_v28  ;;  %v1353_v36 = vpop.permute.xlu1 %1352  ;;  %v1343_v49 = vpop.permute.xlu2 %1342 }
 0x1ae   : > { %1880 = vmatmul.msk.f32.vlgmr.msrb.gmra.mxu0 %vm713_vm0, %v909_v25 }
 0x1af   : > { %1900 = vmatpush.xpose.msk.msra.mxu0 %vm713_vm0, %v1355_v34 }
 0x1b2   : > { %v913_v37 = vpop.permute.xlu0 %912 }
 0x1b3   : > { %1901 = vmatpush.xpose.msk.msra.mxu0 %vm713_vm0, %v1353_v36  ;;  %v1129_v44 = vpop.permute.xlu1 %1128  ;;  %v1347_v55 = vpop.permute.xlu2 %1346 }
 0x1b6   : > { %1881 = vmatmul.msk.f32.gmra.mxu0 %vm713_vm0, %v911_v35 }
 0x1ba   : > { %v1127_v39 = vpop.permute.xlu0 %1126  ;;  %v755_v40 = vpop.f32.mrf.mxu3 }
 0x1bb   : > { %v2781_v41 = vmul.f32 0.17677669, %v755_v40  ;;  %1892 = vmatmul.msk.f32.vlgmr.msrb.gmra.mxu2 %vm713_vm0, %v1127_v39  ;;  %v1131_v50 = vpop.permute.xlu1 %1130  ;;  %v2032_v60 = vpop.permute.xlu2 %2031 }
 0x1bc   : > { %v2033_v61 = vunpack.i.l.bf16 %v2032_v60  ;;  %v2034_v62 = vunpack.i.h.bf16 %v2032_v60 }
 0x1bd   : > { %v771_v42 = vsel %vm713_vm0, %v2781_v41, -inf }
 0x1be   : > { %1882 = vmatmul.msk.f32.gmra.mxu0 %vm713_vm0, %v913_v37  ;;  %772 = vmax.xlane.f32.xlu0 %v771_v42 }
 0x1bf   : > { %1109 = vmatpush.msrb.mxu1 %v2033_v61 }
 0x1c1   : > { %1110 = vmatpush.msrb.mxu1 %v2034_v62 }
 0x1c2   : > { %v1351_v45 = vpop.permute.xlu0 %1350  ;;  %v758_v46 = vpop.f32.mrf.mxu3 }
 0x1c3   : > { %v768_v47 = vmul.f32 0.17677669, %v758_v46  ;;  %1893 = vmatmul.msk.f32.gmra.mxu2 %vm713_vm0, %v1129_v44  ;;  %1902 = vmatpush.xpose.msk.msra.mxu0 %vm713_vm0, %v1351_v45  ;;  %v1345_v63 = vpop.permute.xlu1 %1344 }
 0x1c5   : > { %v774_v48 = vsel %vm713_vm0, %v768_v47, -inf }
 0x1c6   : > { %1883 = vmatmul.msk.f32.gmra.mxu0 %vm713_vm0, %v915_v38  ;;  %775 = vmax.xlane.f32.xlu2 %v774_v48 }
 0x1c7   : > { %1903 = vmatpush.xpose.msk.msra.mxu0 %vm713_vm0, %v1349_v43 }
 0x1ca   : > { %v1341_v51 = vpop.permute.xlu0 %1340  ;;  %v761_v52 = vpop.f32.mrf.mxu3 }
 0x1cb   : > { %v2792_v53 = vmul.f32 0.17677669, %v761_v52  ;;  %1894 = vmatmul.msk.f32.gmra.mxu2 %vm713_vm0, %v1131_v50 }
 0x1cd   : > { %v777_v54 = vsel %vm713_vm0, %v2792_v53, -inf }
 0x1ce   : > { %1904 = vmatmul.msk.f32.vlgmr.msra.gmra.mxu0 %vm713_vm0, %v1341_v51  ;;  %778 = vmax.xlane.f32.xlu0 %v777_v54 }
 0x1d2   : > { %v1133_v56 = vpop.permute.xlu0 %1132  ;;  %v764_v57 = vpop.f32.mrf.mxu3 }
 0x1d3   : > { %v2798_v58 = vmul.f32 0.17677669, %v764_v57  ;;  %1895 = vmatmul.msk.f32.gmra.mxu2 %vm713_vm0, %v1133_v56 }
 0x1d5   : > { %v780_v59 = vsel %vm713_vm0, %v2798_v58, -inf }
 0x1d6   : > { %1905 = vmatmul.msk.f32.gmra.mxu0 %vm713_vm0, %v1343_v49  ;;  %781 = vmax.xlane.f32.xlu2 %v780_v59 }
 0x1da   : > { %v2027_v0 = vpop.permute.xlu0 %2026 }
 0x1db   : > { %v2028_v1 = vunpack.i.l.bf16 %v2027_v0  ;;  %v2029_v2 = vunpack.i.h.bf16 %v2027_v0 }
 0x1dd   : > { %1111 = vmatpush.msrb.mxu1 %v2028_v1 }
 0x1de   : > { %1906 = vmatmul.msk.f32.gmra.mxu0 %vm713_vm0, %v1345_v63 }
 0x1df   : > { %1112 = vmatpush.msrb.mxu1 %v2029_v2 }
 0x1e2   : > { %v2037_v3 = vpop.permute.xlu0 %2036 }
 0x1e3   : > { %v2039_v4 = vunpack.i.h.bf16 %v2037_v3  ;;  %v2038_v5 = vunpack.i.l.bf16 %v2037_v3 }
 0x1e5   : > { %1323 = vmatpush.msra.mxu3 %v2038_v5 }
 0x1e6   : > { %1907 = vmatmul.msk.f32.gmra.mxu0 %vm713_vm0, %v1347_v55 }
 0x1e7   : > { %1324 = vmatpush.msra.mxu3 %v2039_v4 }
 0x22b   : > { %v957_v6 = vpop.f32.mrf.mxu0 }
 0x22c   : > { %v2806_v7 = vmul.f32 0.17677669, %v957_v6 }
 0x22e   : > { %v973_v8 = vsel %vm713_vm0, %v2806_v7, -inf }
 0x22f   : > { %974 = vmax.xlane.f32.xlu1 %v973_v8 }
 0x231   : > { %v773_v13 = vpop.xlane.xlu0 %772 }
 0x232   : > { %v783_v16 = vsub.f32 %v2781_v41, %v773_v13 }
 0x233   : > { %v960_v9 = vpop.f32.mrf.mxu0 }
 0x234   : > { %v2810_v10 = vmul.f32 0.17677669, %v960_v9  ;;  %v787_v20 = vmul.f32 1.442695, %v783_v16 }
 0x236   : > { %v976_v11 = vsel %vm713_vm0, %v2810_v10, -inf  ;;  %2064 = vpow2.f32 %v787_v20 }
 0x237   : > { %977 = vmax.xlane.f32.xlu2 %v976_v11 }
 0x239   : > { %v776_v14 = vpop.xlane.xlu2 %775 }
 0x23a   : > { %v784_v18 = vsub.f32 %v768_v47, %v776_v14 }
 0x23b   : > { %v963_v12 = vpop.f32.mrf.mxu0 }
 0x23c   : > { %v789_v22 = vmul.f32 1.442695, %v784_v18  ;;  %v2819_v25 = vmul.f32 0.17677669, %v963_v12  ;;  %v2828_v34 = vpop.eup %2064 }
 0x23d   : > { %v795_v39 = vsel %vm713_vm0, %v2828_v34, 0.0 }
 0x23e   : > { %v1175_v15 = vpop.f32.mrf.mxu2  ;;  %2066 = vpow2.f32 %v789_v22  ;;  %v979_v30 = vsel %vm713_vm0, %v2819_v25, -inf }
 0x23f   : > { %v2815_v17 = vmul.f32 0.17677669, %v1175_v15 }
 0x241   : > { %v1191_v19 = vsel %vm713_vm0, %v2815_v17, -inf  ;;  %v779_v26 = vpop.xlane.xlu0 %778 }
 0x242   : > { %1192 = vmax.xlane.f32.xlu1 %v1191_v19  ;;  %v785_v29 = vsub.f32 %v2792_v53, %v779_v26 }
 0x243   : > { %v966_v21 = vpop.f32.mrf.mxu0 }
 0x244   : > { %v791_v33 = vmul.f32 1.442695, %v785_v29  ;;  %v2830_v35 = vpop.eup %2066  ;;  %v2840_v42 = vmul.f32 0.17677669, %v966_v21 }
 0x245   : > { %v798_v38 = vsel %vm713_vm0, %v2830_v35, 0.0 }
 0x246   : > { %v1178_v27 = vpop.f32.mrf.mxu2  ;;  %2068 = vpow2.f32 %v791_v33  ;;  %v982_v48 = vsel %vm713_vm0, %v2840_v42, -inf }
 0x247   : > { %v2821_v28 = vmul.f32 0.17677669, %v1178_v27 }
 0x249   : > { %v1194_v31 = vsel %vm713_vm0, %v2821_v28, -inf  ;;  %v782_v43 = vpop.xlane.xlu2 %781 }
 0x24a   : > { %980 = vmax.xlane.f32.xlu1 %v979_v30  ;;  %1195 = vmax.xlane.f32.xlu0 %v1194_v31  ;;  %v786_v47 = vsub.f32 %v2798_v58, %v782_v43 }
 0x24b   : > { %v1389_v32 = vpop.f32.mrf.mxu0 }
 0x24c   : > { %v2842_v44 = vpop.eup %2068  ;;  %v793_v52 = vmul.f32 1.442695, %v786_v47  ;;  %v2855_v54 = vmul.f32 0.17677669, %v1389_v32 }
 0x24d   : > { %v801_v49 = vsel %vm713_vm0, %v2842_v44, 0.0 }
 0x24e   : > { %v1181_v36 = vpop.f32.mrf.mxu2  ;;  %2070 = vpow2.f32 %v793_v52  ;;  %v1405_v56 = vsel %vm713_vm0, %v2855_v54, -inf }
 0x24f   : > { %v2832_v37 = vmul.f32 0.17677669, %v1181_v36 }
 0x251   : > { %v1197_v40 = vsel %vm713_vm0, %v2832_v37, -inf }
 0x252   : > { %799 = vadd.xlane.f32.xlu1 %v798_v38  ;;  %796 = vadd.xlane.f32.xlu0 %v795_v39 }
 0x253   : > { %1198 = vmax.xlane.f32.xlu2 %v1197_v40  ;;  %v1392_v41 = vpop.f32.mrf.mxu0 }
 0x254   : > { %v2853_v53 = vmul.f32 0.17677669, %v1392_v41  ;;  %v2861_v58 = vpop.eup %2070 }
 0x255   : > { %v804_v60 = vsel %vm713_vm0, %v2861_v58, 0.0 }
 0x256   : > { %v1184_v45 = vpop.f32.mrf.mxu2  ;;  %v1408_v55 = vsel %vm713_vm0, %v2853_v53, -inf }
 0x257   : > { %v2844_v46 = vmul.f32 0.17677669, %v1184_v45 }
 0x259   : > { %v1200_v50 = vsel %vm713_vm0, %v2844_v46, -inf }
 0x25a   : > { %983 = vmax.xlane.f32.xlu0 %v982_v48  ;;  %802 = vadd.xlane.f32.xlu1 %v801_v49 }
 0x25b   : > { %1201 = vmax.xlane.f32.xlu2 %v1200_v50  ;;  %v1395_v51 = vpop.f32.mrf.mxu0 }
 0x25c   : > { %v2869_v62 = vmul.f32 0.17677669, %v1395_v51 }
 0x25e   : > { %v1411_v63 = vsel %vm713_vm0, %v2869_v62, -inf }
 0x262   : > { %1409 = vmax.xlane.f32.xlu1 %v1408_v55 }
 0x263   : > { %1406 = vmax.xlane.f32.xlu2 %v1405_v56  ;;  %v1398_v57 = vpop.f32.mrf.mxu0 }
 0x264   : > { %v2863_v59 = vmul.f32 0.17677669, %v1398_v57 }
 0x266   : > { %v1414_v61 = vsel %vm713_vm0, %v2863_v59, -inf }
 0x26a   : > { %805 = vadd.xlane.f32.xlu1 %v804_v60 }
 0x26b   : > { %1415 = vmax.xlane.f32.xlu2 %v1414_v61 }
 0x272   : > { %1412 = vmax.xlane.f32.xlu1 %v1411_v63 }
 0x2a2   : > { %v975_v0 = vpop.xlane.xlu1 %974 }
 0x2a3   : > { %v985_v1 = vsub.f32 %v2806_v7, %v975_v0 }
 0x2a5   : > { %v989_v2 = vmul.f32 1.442695, %v985_v1 }
 0x2a7   : > { %2072 = vpow2.f32 %v989_v2 }
 0x2aa   : > { %v978_v3 = vpop.xlane.xlu2 %977 }
 0x2ab   : > { %v986_v4 = vsub.f32 %v2810_v10, %v978_v3 }
 0x2ad   : > { %v2875_v5 = vpop.eup %2072  ;;  %v991_v6 = vmul.f32 1.442695, %v986_v4 }
 0x2ae   : > { %v997_v8 = vsel %vm713_vm0, %v2875_v5, 0.0 }
 0x2af   : > { %2074 = vpow2.f32 %v991_v6  ;;  %998 = vadd.xlane.f32.xlu0 %v997_v8 }
 0x2b5   : > { %v2879_v9 = vpop.eup %2074  ;;  %v1193_v11 = vpop.xlane.xlu1 %1192 }
 0x2b6   : > { %v1203_v12 = vsub.f32 %v2815_v17, %v1193_v11  ;;  %v1000_v7 = vsel %vm713_vm0, %v2879_v9, 0.0 }
 0x2b7   : > { %1001 = vadd.xlane.f32.xlu0 %v1000_v7 }
 0x2b8   : > { %v1207_v13 = vmul.f32 1.442695, %v1203_v12 }
 0x2ba   : > { %2076 = vpow2.f32 %v1207_v13 }
 0x2bd   : > { %v981_v10 = vpop.xlane.xlu1 %980  ;;  %v1196_v14 = vpop.xlane.xlu0 %1195 }
 0x2be   : > { %v987_v15 = vsub.f32 %v2819_v25, %v981_v10  ;;  %v1204_v16 = vsub.f32 %v2821_v28, %v1196_v14 }
 0x2c0   : > { %v2886_v18 = vpop.eup %2076  ;;  %v993_v19 = vmul.f32 1.442695, %v987_v15  ;;  %v1209_v20 = vmul.f32 1.442695, %v1204_v16 }
 0x2c1   : > { %v1215_v21 = vsel %vm713_vm0, %v2886_v18, 0.0 }
 0x2c2   : > { %2078 = vpow2.f32 %v993_v19  ;;  %1216 = vadd.xlane.f32.xlu1 %v1215_v21 }
 0x2c3   : > { %2080 = vpow2.f32 %v1209_v20 }
 0x2c5   : > { %v2890_v17 = vpop.xlane.xlu1 %799  ;;  %v797_v22 = vpop.xlane.xlu0 %796 }
 0x2c6   : > { %2082 = vrcp.f32 %v2890_v17  ;;  %v1199_v26 = vpop.xlane.xlu2 %1198  ;;  %v816_v48 = vand.u32 2147483647, %v797_v22  ;;  %v818_v50 = vand.u32 2147483648, %v797_v22  ;;  %vm812_vm2 = vweird.f32 %v797_v22 }
 0x2c7   : > { %2084 = vrcp.f32 %v797_v22  ;;  %v1205_v25 = vsub.f32 %v2832_v37, %v1199_v26  ;;  %v833_v3 = vand.u32 2147483648, %v2890_v17  ;;  %vm827_vm6 = vweird.f32 %v2890_v17 }
 0x2c8   : > { %v2894_v27 = vpop.eup %2078  ;;  %vm817_vm4 = vcmp.eq.f32.partialorder %v816_v48, 8.507059e+37  ;;  %v831_v12 = vand.u32 2147483647, %v2890_v17 }
 0x2c9   : > { %v2896_v28 = vpop.eup %2080  ;;  %v1211_v29 = vmul.f32 1.442695, %v1205_v25  ;;  %v1003_v30 = vsel %vm713_vm0, %v2894_v27, 0.0  ;;  %v834_v16 = vor.u32 1.1754944e-38, %v833_v3 }
 0x2ca   : > { %v1218_v31 = vsel %vm713_vm0, %v2896_v28, 0.0  ;;  %1004 = vadd.xlane.f32.xlu0 %v1003_v30  ;;  %vm832_vm8 = vcmp.eq.f32.partialorder %v831_v12, 8.507059e+37 }
 0x2cb   : > { %2086 = vpow2.f32 %v1211_v29  ;;  %1219 = vadd.xlane.f32.xlu1 %v1218_v31 }
 0x2cc   : > { %v2083_v32 = vpop.eup %2082 }
 0x2cd   : > { %v2085_v33 = vpop.eup %2084  ;;  %v823_v36 = vmul.f32 %v2083_v32, %v2890_v17  ;;  %v2903_v38 = vpop.xlane.xlu1 %802  ;;  %vm828_vm5 = vweird.f32 %v2083_v32 }
 0x2ce   : > { %v984_v37 = vpop.xlane.xlu0 %983  ;;  %v808_v39 = vmul.f32 %v2085_v33, %v797_v22  ;;  %2088 = vrcp.f32 %v2903_v38  ;;  %v1202_v40 = vpop.xlane.xlu2 %1201  ;;  %vm813_vm1 = vweird.f32 %v2085_v33  ;;  %vm829_vm7 = vmor %vm827_vm6, %vm828_vm5  ;;  %v848_v17 = vand.u32 2147483648, %v2903_v38 }
 0x2cf   : > { %v824_v41 = vsub.f32 1.0, %v823_v36  ;;  %v988_v43 = vsub.f32 %v2840_v42, %v984_v37  ;;  %v1206_v45 = vsub.f32 %v2844_v46, %v1202_v40  ;;  %vm814_vm3 = vmor %vm812_vm2, %vm813_vm1  ;;  %v819_v42 = vor.u32 1.1754944e-38, %v818_v50 }
 0x2d0   : > { %v809_v47 = vsub.f32 1.0, %v808_v39  ;;  %vm842_vm10 = vweird.f32 %v2903_v38  ;;  %v846_v26 = vand.u32 2147483647, %v2903_v38  ;;  %v849_v31 = vor.u32 1.1754944e-38, %v848_v17 }
 0x2d1   : > { %v2908_v49 = vpop.eup %2086  ;;  %v995_v51 = vmul.f32 1.442695, %v988_v43  ;;  %v1213_v52 = vmul.f32 1.442695, %v1206_v45  ;;  %v825_v55 = vmul.f32 %v2083_v32, %v824_v41 }
 0x2d2   : > { %v810_v56 = vmul.f32 %v2085_v33, %v809_v47  ;;  %v1221_v57 = vsel %vm713_vm0, %v2908_v49, 0.0  ;;  %vm847_vm12 = vcmp.eq.f32.partialorder %v846_v26, 8.507059e+37 }
 0x2d3   : > { %2090 = vpow2.f32 %v995_v51  ;;  %1222 = vadd.xlane.f32.xlu0 %v1221_v57  ;;  %v826_v2 = vadd.f32 %v2083_v32, %v825_v55 }
 0x2d4   : > { %v2089_v60 = vpop.eup %2088  ;;  %v811_v61 = vadd.f32 %v2085_v33, %v810_v56  ;;  %2092 = vpow2.f32 %v1213_v52 }
 0x2d5   : > { %v838_v46 = vmul.f32 %v2089_v60, %v2903_v38  ;;  %v2913_v63 = vpop.xlane.xlu1 %1409  ;;  %vm843_vm9 = vweird.f32 %v2089_v60 }
 0x2d6   : > { %v1407_v0 = vpop.xlane.xlu2 %1406  ;;  %v815_v1 = vsel %vm814_vm3, %v2085_v33, %v811_v61  ;;  %vm844_vm11 = vmor %vm842_vm10, %vm843_vm9 }
 0x2d7   : > { %v839_v4 = vsub.f32 1.0, %v838_v46  ;;  %v1417_v6 = vsub.f32 %v2855_v54, %v1407_v0  ;;  %v820_v8 = vsel %vm817_vm4, %v819_v42, %v815_v1  ;;  %v830_v54 = vsel %vm829_vm7, %v2083_v32, %v826_v2 }
 0x2d8   : > { %v821_v11 = vmul.f32 %v2828_v34, %v820_v8  ;;  %v835_v20 = vsel %vm832_vm8, %v834_v16, %v830_v54 }
 0x2d9   : > { %v2920_v7 = vpop.eup %2090  ;;  %v1421_v13 = vmul.f32 1.442695, %v1417_v6  ;;  %v840_v14 = vmul.f32 %v2089_v60, %v839_v4  ;;  %v836_v22 = vmul.f32 %v2830_v35, %v835_v20 }
 0x2da   : > { %v2922_v10 = vpop.eup %2092  ;;  %1872 = vmatmul.msk.f32.vlgmr.msrb.gmra.mxu3 %vm713_vm0, %v821_v11  ;;  %v1006_v15 = vsel %vm713_vm0, %v2920_v7, 0.0 }
 0x2db   : > { %2094 = vpow2.f32 %v1421_v13  ;;  %1007 = vadd.xlane.f32.xlu1 %v1006_v15  ;;  %v1224_v34 = vsel %vm713_vm0, %v2922_v10, 0.0  ;;  %v841_v21 = vadd.f32 %v2089_v60, %v840_v14 }
 0x2dc   : > { %1225 = vadd.xlane.f32.xlu0 %v1224_v34 }
 0x2dd   : > { %v806_v19 = vpop.xlane.xlu1 %805  ;;  %v845_v30 = vsel %vm844_vm11, %v2089_v60, %v841_v21 }
 0x2de   : > { %2096 = vrcp.f32 %v806_v19  ;;  %v850_v36 = vsel %vm847_vm12, %v849_v31, %v845_v30  ;;  %v863_v39 = vand.u32 2147483648, %v806_v19  ;;  %v861_v40 = vand.u32 2147483647, %v806_v19  ;;  %v1416_v50 = vpop.xlane.xlu2 %1415 }
 0x2df   : > { %v851_v35 = vmul.f32 %v2842_v44, %v850_v36  ;;  %vm857_vm14 = vweird.f32 %v806_v19  ;;  %v1418_v44 = vsub.f32 %v2853_v53, %v2913_v63  ;;  %v1420_v55 = vsub.f32 %v2863_v59, %v1416_v50 }
 0x2e0   : > { %v864_v43 = vor.u32 1.1754944e-38, %v863_v39  ;;  %vm862_vm1 = vcmp.eq.f32.partialorder %v861_v40, 8.507059e+37 }
 0x2e1   : > { %v2933_v25 = vpop.eup %2094  ;;  %v1423_v51 = vmul.f32 1.442695, %v1418_v44  ;;  %v1427_v56 = vmul.f32 1.442695, %v1420_v55 }
 0x2e2   : > { %1873 = vmatmul.msk.f32.gmra.mxu3 %vm713_vm0, %v836_v22  ;;  %v1429_v29 = vsel %vm713_vm0, %v2933_v25, 0.0 }
 0x2e3   : > { %1430 = vadd.xlane.f32.xlu2 %v1429_v29  ;;  %2098 = vpow2.f32 %v1423_v51 }
 0x2e4   : > { %v2097_v32 = vpop.eup %2096  ;;  %2100 = vpow2.f32 %v1427_v56 }
 0x2e5   : > { %v853_v33 = vmul.f32 %v2097_v32, %v806_v19  ;;  %vm858_vm13 = vweird.f32 %v2097_v32  ;;  %v1413_v52 = vpop.xlane.xlu1 %1412 }
 0x2e6   : > { %vm859_vm15 = vmor %vm857_vm14, %vm858_vm13 }
 0x2e7   : > { %v854_v37 = vsub.f32 1.0, %v853_v33 }
 0x2e9   : > { %v855_v38 = vmul.f32 %v2097_v32, %v854_v37  ;;  %v2952_v60 = vpop.eup %2098 }
 0x2ea   : > { %1874 = vmatmul.msk.f32.gmra.mxu3 %vm713_vm0, %v851_v35 }
 0x2eb   : > { %v856_v41 = vadd.f32 %v2097_v32, %v855_v38 }
 0x2ed   : > { %v860_v45 = vsel %vm859_vm15, %v2097_v32, %v856_v41 }
 0x2ee   : > { %v865_v47 = vsel %vm862_vm1, %v864_v43, %v860_v45 }
 0x2ef   : > { %v866_v48 = vmul.f32 %v2861_v58, %v865_v47  ;;  %v1419_v58 = vsub.f32 %v2869_v62, %v1413_v52 }
 0x2f0   : > { %2051 = vrot.lane.b32.xlu0 %v2759_v23, %s2426_s7 }
 0x2f1   : > { %v1425_v57 = vmul.f32 1.442695, %v1419_v58 }
 0x2f2   : > { %1875 = vmatmul.msk.f32.gmra.mxu3 %vm713_vm0, %v866_v48 }
 0x2f3   : > { %2102 = vpow2.f32 %v1425_v57 }
 0x2f4   : > { %2041 = vrot.lane.b32.xlu1 %v2759_v23, %s2425_s9  ;;  %v1432_v23 = vsel %vm713_vm0, %v2952_v60, 0.0 }
 0x2fb   : > { %2046 = vrot.lane.b32.xlu2 %v2763_v24, %s2426_s7  ;;  %v2956_v24 = vpop.eup %2100 }
 0x2fc   : > { %v2958_v53 = vpop.eup %2102  ;;  %v1438_v59 = vsel %vm713_vm0, %v2956_v24, 0.0 }
 0x2fd   : > { %v1435_v62 = vsel %vm713_vm0, %v2958_v53, 0.0 }
 0x31e   : > { %1433 = vadd.xlane.f32.xlu1 %v1432_v23 }
 0x322   : > { %v999_v61 = vpop.xlane.xlu0 %998 }
 0x323   : > { %2104 = vrcp.f32 %v999_v61  ;;  %v1020_v1 = vand.u32 2147483648, %v999_v61  ;;  %v1018_v3 = vand.u32 2147483647, %v999_v61  ;;  %vm1014_vm3 = vweird.f32 %v999_v61 }
 0x324   : > { %1439 = vadd.xlane.f32.xlu2 %v1438_v59 }
 0x325   : > { %v1021_v8 = vor.u32 1.1754944e-38, %v1020_v1  ;;  %vm1019_vm5 = vcmp.eq.f32.partialorder %v1018_v3, 8.507059e+37 }
 0x326   : > { %1436 = vadd.xlane.f32.xlu1 %v1435_v62 }
 0x329   : > { %v2105_v42 = vpop.eup %2104 }
 0x32a   : > { %v1010_v46 = vmul.f32 %v2105_v42, %v999_v61  ;;  %v1002_v63 = vpop.xlane.xlu0 %1001  ;;  %vm1015_vm2 = vweird.f32 %v2105_v42 }
 0x32b   : > { %2106 = vrcp.f32 %v1002_v63  ;;  %vm1016_vm4 = vmor %vm1014_vm3, %vm1015_vm2  ;;  %v1035_v54 = vand.u32 2147483648, %v1002_v63  ;;  %v1033_v34 = vand.u32 2147483647, %v1002_v63  ;;  %vm1029_vm7 = vweird.f32 %v1002_v63 }
 0x32c   : > { %v1011_v0 = vsub.f32 1.0, %v1010_v46 }
 0x32d   : > { %v1036_v20 = vor.u32 1.1754944e-38, %v1035_v54  ;;  %vm1034_vm9 = vcmp.eq.f32.partialorder %v1033_v34, 8.507059e+37 }
 0x32e   : > { %v1012_v2 = vmul.f32 %v2105_v42, %v1011_v0 }
 0x330   : > { %v1013_v4 = vadd.f32 %v2105_v42, %v1012_v2 }
 0x331   : > { %v2107_v6 = vpop.eup %2106 }
 0x332   : > { %v1025_v11 = vmul.f32 %v2107_v6, %v1002_v63  ;;  %v1017_v12 = vsel %vm1016_vm4, %v2105_v42, %v1013_v4  ;;  %vm1030_vm6 = vweird.f32 %v2107_v6 }
 0x333   : > { %v1022_v13 = vsel %vm1019_vm5, %v1021_v8, %v1017_v12  ;;  %vm1031_vm8 = vmor %vm1029_vm7, %vm1030_vm6 }
 0x334   : > { %v1026_v14 = vsub.f32 1.0, %v1025_v11  ;;  %v1023_v15 = vmul.f32 %v2875_v5, %v1022_v13 }
 0x335   : > { %v2966_v22 = vpop.xlane.xlu1 %1216 }
 0x336   : > { %v1027_v16 = vmul.f32 %v2107_v6, %v1026_v14  ;;  %1884 = vmatmul.msk.f32.vlgmr.msrb.gmra.mxu1 %vm713_vm0, %v1023_v15  ;;  %vm1232_vm4 = vweird.f32 %v2966_v22  ;;  %v1238_v12 = vand.u32 2147483648, %v2966_v22  ;;  %v1236_v54 = vand.u32 2147483647, %v2966_v22 }
 0x338   : > { %v1028_v19 = vadd.f32 %v2107_v6, %v1027_v16 }
 0x33a   : > { %v1032_v21 = vsel %vm1031_vm8, %v2107_v6, %v1028_v19 }
 0x33b   : > { %v1037_v17 = vsel %vm1034_vm9, %v1036_v20, %v1032_v21  ;;  %vm1237_vm9 = vcmp.eq.f32.partialorder %v1236_v54, 8.507059e+37 }
 0x33c   : > { %v1038_v26 = vmul.f32 %v2879_v9, %v1037_v17 }
 0x33d   : > { %v1005_v29 = vpop.xlane.xlu0 %1004 }
 0x33e   : > { %2108 = vrcp.f32 %v1005_v29  ;;  %1885 = vmatmul.msk.f32.gmra.mxu1 %vm713_vm0, %v1038_v26  ;;  %v2970_v31 = vpop.xlane.xlu1 %1219  ;;  %v1050_v33 = vand.u32 2147483648, %v1005_v29  ;;  %v1048_v37 = vand.u32 2147483647, %v1005_v29  ;;  %vm1044_vm11 = vweird.f32 %v1005_v29 }
 0x33f   : > { %2110 = vrcp.f32 %v2966_v22  ;;  %v1239_v26 = vor.u32 1.1754944e-38, %v1238_v12 }
 0x340   : > { %v1051_v35 = vor.u32 1.1754944e-38, %v1050_v33  ;;  %vm1049_vm13 = vcmp.eq.f32.partialorder %v1048_v37, 8.507059e+37 }
 0x344   : > { %v2109_v5 = vpop.eup %2108 }
 0x345   : > { %v1040_v30 = vmul.f32 %v2109_v5, %v1005_v29  ;;  %vm1045_vm10 = vweird.f32 %v2109_v5  ;;  %v2974_v43 = vpop.eup %2110 }
 0x346   : > { %vm1046_vm12 = vmor %vm1044_vm11, %vm1045_vm10  ;;  %v2976_v45 = vpop.xlane.xlu0 %1222  ;;  %v1228_v47 = vmul.f32 %v2974_v43, %v2966_v22  ;;  %vm1233_vm3 = vweird.f32 %v2974_v43 }
 0x347   : > { %v1041_v32 = vsub.f32 1.0, %v1040_v30  ;;  %vm2997_vm5 = vmor %vm1232_vm4, %vm1233_vm3 }
 0x348   : > { %v1229_v51 = vsub.f32 1.0, %v1228_v47  ;;  %v1251_v47 = vand.u32 2147483647, %v2970_v31 }
 0x349   : > { %v1042_v36 = vmul.f32 %v2109_v5, %v1041_v32 }
 0x34a   : > { %v1230_v23 = vmul.f32 %v2974_v43, %v1229_v51 }
 0x34b   : > { %v1043_v39 = vadd.f32 %v2109_v5, %v1042_v36 }
 0x34c   : > { %v1231_v1 = vadd.f32 %v2974_v43, %v1230_v23 }
 0x34d   : > { %v1047_v9 = vsel %vm1046_vm12, %v2109_v5, %v1043_v39  ;;  %vm1247_vm12 = vweird.f32 %v2970_v31 }
 0x34e   : > { %v1008_v38 = vpop.xlane.xlu1 %1007  ;;  %v1052_v40 = vsel %vm1049_vm13, %v1051_v35, %v1047_v9 }
 0x34f   : > { %2112 = vrcp.f32 %v1008_v38  ;;  %v1053_v41 = vmul.f32 %v2894_v27, %v1052_v40  ;;  %v1065_v27 = vand.u32 2147483648, %v1008_v38  ;;  %v2984_v56 = vpop.xlane.xlu0 %1225  ;;  %v1063_v57 = vand.u32 2147483647, %v1008_v38 }
 0x350   : > { %2114 = vrcp.f32 %v2970_v31  ;;  %vm1059_vm15 = vweird.f32 %v1008_v38  ;;  %v1253_v40 = vand.u32 2147483648, %v2970_v31 }
 0x351   : > { %1886 = vmatmul.msk.f32.gmra.mxu1 %vm713_vm0, %v1053_v41  ;;  %v1066_v42 = vor.u32 1.1754944e-38, %v1065_v27  ;;  %vm1064_vm2 = vcmp.eq.f32.partialorder %v1063_v57, 8.507059e+37 }
 0x355   : > { %v2113_v48 = vpop.eup %2112 }
 0x356   : > { %v1055_v44 = vmul.f32 %v2113_v48, %v1008_v38  ;;  %v1431_v50 = vpop.xlane.xlu2 %1430  ;;  %v2982_v55 = vpop.eup %2114  ;;  %vm1060_vm14 = vweird.f32 %v2113_v48 }
 0x357   : > { %2116 = vrcp.f32 %v1431_v50  ;;  %v1243_v61 = vmul.f32 %v2982_v55, %v2970_v31  ;;  %vm1061_vm1 = vmor %vm1059_vm15, %vm1060_vm14  ;;  %v1452_v13 = vand.u32 2147483648, %v1431_v50  ;;  %v1450_v34 = vand.u32 2147483647, %v1431_v50 }
 0x358   : > { %v1056_v52 = vsub.f32 1.0, %v1055_v44  ;;  %2118 = vrcp.f32 %v2976_v45  ;;  %vm1446_vm7 = vweird.f32 %v1431_v50  ;;  %vm1248_vm11 = vweird.f32 %v2982_v55 }
 0x359   : > { %v1244_v4 = vsub.f32 1.0, %v1243_v61  ;;  %2120 = vrcp.f32 %v2984_v56  ;;  %v1453_v29 = vor.u32 1.1754944e-38, %v1452_v13  ;;  %vm1451_vm10 = vcmp.eq.f32.partialorder %v1450_v34, 8.507059e+37  ;;  %vm1249_vm13 = vmor %vm1247_vm12, %vm1248_vm11 }
 0x35a   : > { %v1057_v58 = vmul.f32 %v2113_v48, %v1056_v52  ;;  %vm1252_vm14 = vcmp.eq.f32.partialorder %v1251_v47, 8.507059e+37 }
 0x35b   : > { %v1245_v21 = vmul.f32 %v2982_v55, %v1244_v4 }
 0x35c   : > { %v1058_v59 = vadd.f32 %v2113_v48, %v1057_v58  ;;  %v1266_v58 = vand.u32 2147483647, %v2976_v45 }
 0x35d   : > { %v2117_v62 = vpop.eup %2116  ;;  %v1246_v9 = vadd.f32 %v2982_v55, %v1245_v21  ;;  %v3044_v47 = vpop.f32.mrf.mxu3 }
 0x35e   : > { %v1442_v46 = vmul.f32 %v2117_v62, %v1431_v50  ;;  %v2047_v63 = vpop.permute.xlu2 %2046  ;;  %v1062_v0 = vsel %vm1061_vm1, %v2113_v48, %v1058_v59  ;;  %v2993_v11 = vpop.eup %2118  ;;  %vm1447_vm6 = vweird.f32 %v2117_v62  ;;  %v1254_v50 = vor.u32 1.1754944e-38, %v1253_v40 }
 0x35f   : > { %v2048_v2 = vunpack.i.l.bf16 %v2047_v63  ;;  %v1067_v3 = vsel %vm1064_vm2, %v1066_v42, %v1062_v0  ;;  %v2049_v14 = vunpack.i.h.bf16 %v2047_v63  ;;  %v1258_v17 = vmul.f32 %v2993_v11, %v2976_v45  ;;  %vm1448_vm8 = vmor %vm1446_vm7, %vm1447_vm6  ;;  %v2121_v38 = vpop.eup %2120 }
 0x360   : > { %v1443_v6 = vsub.f32 1.0, %v1442_v46  ;;  %v1068_v8 = vmul.f32 %v2920_v7, %v1067_v3  ;;  %v1235_v7 = vsel %vm2997_vm5, %v2974_v43, %v1231_v1  ;;  %v1273_v48 = vmul.f32 %v2121_v38, %v2984_v56 }
 0x361   : > { %1537 = vmatpush.msra.mxu1 %v2048_v2  ;;  %v1240_v33 = vsel %vm1237_vm9, %v1239_v26, %v1235_v7  ;;  %v1259_v39 = vsub.f32 1.0, %v1258_v17  ;;  %v1250_v44 = vsel %vm1249_vm13, %v2982_v55, %v1246_v9  ;;  %vm1263_vm15 = vweird.f32 %v2993_v11 }
 0x362   : > { %v1444_v16 = vmul.f32 %v2117_v62, %v1443_v6  ;;  %v2052_v19 = vpop.permute.xlu0 %2051  ;;  %1887 = vmatmul.msk.f32.gmra.mxu1 %vm713_vm0, %v1068_v8  ;;  %v1241_v43 = vmul.f32 %v2886_v18, %v1240_v33  ;;  %v1255_v51 = vsel %vm1252_vm14, %v1254_v50, %v1250_v44  ;;  %v1274_v52 = vsub.f32 1.0, %v1273_v48 }
 0x363   : > { %v2053_v20 = vunpack.i.l.bf16 %v2052_v19  ;;  %1538 = vmatpush.msra.mxu1 %v2049_v14  ;;  %v2054_v5 = vunpack.i.h.bf16 %v2052_v19  ;;  %v1268_v18 = vand.u32 2147483648, %v2976_v45  ;;  %vm1262_vm1 = vweird.f32 %v2976_v45 }
 0x364   : > { %v1445_v22 = vadd.f32 %v2117_v62, %v1444_v16  ;;  %v1256_v31 = vmul.f32 %v2896_v28, %v1255_v51  ;;  %vm1264_vm2 = vmor %vm1262_vm1, %vm1263_vm15  ;;  %v1275_v57 = vmul.f32 %v2121_v38, %v1274_v52  ;;  %vm1267_vm3 = vcmp.eq.f32.partialorder %v1266_v58, 8.507059e+37  ;;  %v1629_v58 = vld [vmem:[#allocation13 + $0x68] sm:$0xff] }
 0x365   : > { %1539 = vmatpush.msra.mxu1 %v2053_v20  ;;  %v1269_v23 = vor.u32 1.1754944e-38, %v1268_v18  ;;  %vm1278_vm4 = vweird.f32 %v2121_v38  ;;  %vm1277_vm5 = vweird.f32 %v2984_v56  ;;  %v1281_v28 = vand.u32 2147483647, %v2984_v56  ;;  %v1631_v18 = vld [vmem:[#allocation13 + $0x78] sm:$0xff] }
 0x366   : > { %v1449_v30 = vsel %vm1448_vm8, %v2117_v62, %v1445_v22  ;;  %v2042_v32 = vpop.permute.xlu1 %2041  ;;  %v1276_v59 = vadd.f32 %v2121_v38, %v1275_v57  ;;  %v1283_v62 = vand.u32 2147483648, %v2984_v56  ;;  %vm1279_vm6 = vmor %vm1277_vm5, %vm1278_vm4  ;;  %1636 = vmatpush.msra.mxu2 %v1631_v18  ;;  %v1628_v57 = vld [vmem:[#allocation13 + $0x60] sm:$0xff]  ;;  %vm1606_vm5 = vcmask 523264  }
 0x367   : > { %v1454_v36 = vsel %vm1451_vm10, %v1453_v29, %v1449_v30  ;;  %v2043_v37 = vunpack.i.l.bf16 %v2042_v32  ;;  %1540 = vmatpush.msra.mxu1 %v2054_v5  ;;  %v2044_v41 = vunpack.i.h.bf16 %v2042_v32  ;;  %vm1282_vm7 = vcmp.eq.f32.partialorder %v1281_v28, 8.507059e+37 }
 0x368   : > { %v1455_v35 = vmul.f32 %v2933_v25, %v1454_v36  ;;  %v1260_v25 = vmul.f32 %v2993_v11, %v1259_v39  ;;  %v1280_v45 = vsel %vm1279_vm6, %v2121_v38, %v1276_v59  ;;  %v1284_v46 = vor.u32 1.1754944e-38, %v1283_v62 }
 0x369   : > { %1325 = vmatpush.msra.mxu3 %v2043_v37  ;;  %vm1611_vm6 = vcmask 785408  }
 0x36a   : > { %1908 = vmatmul.msk.f32.vlgmr.msra.gmra.mxu1 %vm713_vm0, %v1455_v35  ;;  %v1261_v27 = vadd.f32 %v2993_v11, %v1260_v25  ;;  %v1285_v63 = vsel %vm1282_vm7, %v1284_v46, %v1280_v45  ;;  %v1624_v45 = vld [vmem:[#allocation13 + $0x40] sm:$0xff]  ;;  %v1623_v46 = vld [vmem:[#allocation13 + $0x38] sm:$0xff] }
 0x36b   : > { %1326 = vmatpush.msra.mxu3 %v2044_v41  ;;  %v1286_v0 = vmul.f32 %v2922_v10, %v1285_v63  ;;  %v1622_v63 = vld [vmem:[#allocation13 + $0x30] sm:$0xff] }
 0x36c   : > { %1896 = vmatmul.msk.f32.vlgmr.msra.gmra.mxu3 %vm713_vm0, %v1241_v43  ;;  %v1265_v55 = vsel %vm1264_vm2, %v2993_v11, %v1261_v27 }
 0x36d   : > { %v1270_v61 = vsel %vm1267_vm3, %v1269_v23, %v1265_v55  ;;  %v1627_v55 = vld [vmem:[#allocation13 + $0x58] sm:$0xff]  ;;  %v1626_v23 = vld [vmem:[#allocation13 + $0x50] sm:$0xff] }
 0x36e   : > { %v1271_v42 = vmul.f32 %v2908_v49, %v1270_v61  ;;  %v1625_v61 = vld [vmem:[#allocation13 + $0x48] sm:$0xff] }
 0x374   : > { %1897 = vmatmul.msk.f32.gmra.mxu3 %vm713_vm0, %v1256_v31  ;;  %v1630_v31 = vld [vmem:[#allocation13 + $0x70] sm:$0xff] }
 0x375   : > { %1637 = vmatpush.msra.mxu2 %v1630_v31 }
 0x377   : > { %1638 = vmatpush.msra.mxu2 %v1629_v58 }
 0x379   : > { %1639 = vmatpush.msra.mxu2 %v1628_v57 }
 0x37b   : > { %1640 = vmatpush.msra.mxu2 %v1627_v55 }
 0x37c   : > { %1898 = vmatmul.msk.f32.gmra.mxu3 %vm713_vm0, %v1271_v42 }
 0x37d   : > { %1641 = vmatpush.msra.mxu2 %v1626_v23 }
 0x37f   : > { %1642 = vmatpush.msra.mxu2 %v1625_v61 }
 0x381   : > { %1643 = vmatpush.msra.mxu2 %v1624_v45 }
 0x383   : > { %1644 = vmatpush.msra.mxu2 %v1623_v46 }
 0x384   : > { %1899 = vmatmul.msk.f32.gmra.mxu3 %vm713_vm0, %v1286_v0  ;;  %v1621_v0 = vld [vmem:[#allocation13 + $0x28] sm:$0xff] }
 0x385   : > { %1645 = vmatpush.msra.mxu2 %v1622_v63 }
 0x387   : > { %1646 = vmatpush.msra.mxu2 %v1621_v0 }
 0x391   : > { %v1434_v1 = vpop.xlane.xlu1 %1433 }
 0x392   : > { %2122 = vrcp.f32 %v1434_v1  ;;  %v1467_v6 = vand.u32 2147483648, %v1434_v1  ;;  %v1465_v11 = vand.u32 2147483647, %v1434_v1  ;;  %vm1461_vm9 = vweird.f32 %v1434_v1 }
 0x394   : > { %v1468_v15 = vor.u32 1.1754944e-38, %v1467_v6  ;;  %vm1466_vm11 = vcmp.eq.f32.partialorder %v1465_v11, 8.507059e+37 }
 0x397   : > { %v1440_v2 = vpop.xlane.xlu2 %1439 }
 0x398   : > { %v2123_v3 = vpop.eup %2122  ;;  %2124 = vrcp.f32 %v1440_v2  ;;  %v1497_v33 = vand.u32 2147483648, %v1440_v2  ;;  %vm1491_vm2 = vweird.f32 %v1440_v2  ;;  %v1495_v37 = vand.u32 2147483647, %v1440_v2 }
 0x399   : > { %v1457_v4 = vmul.f32 %v2123_v3, %v1434_v1  ;;  %v1437_v49 = vpop.xlane.xlu1 %1436  ;;  %vm1462_vm8 = vweird.f32 %v2123_v3  ;;  %v1620_v1 = vld [vmem:[#allocation13 + $0x20] sm:$0xff] }
 0x39a   : > { %2126 = vrcp.f32 %v1437_v49  ;;  %vm1463_vm10 = vmor %vm1461_vm9, %vm1462_vm8  ;;  %v1482_v21 = vand.u32 2147483648, %v1437_v49  ;;  %v1480_v26 = vand.u32 2147483647, %v1437_v49  ;;  %vm1476_vm13 = vweird.f32 %v1437_v49  ;;  %1647 = vmatpush.msra.mxu2 %v1620_v1 }
 0x39b   : > { %v1458_v56 = vsub.f32 1.0, %v1457_v4  ;;  %v1498_v35 = vor.u32 1.1754944e-38, %v1497_v33  ;;  %vm1496_vm4 = vcmp.eq.f32.partialorder %v1495_v37, 8.507059e+37  ;;  %v1617_v4 = vld [vmem:[#allocation13 + $0x8] sm:$0xff] }
 0x39c   : > { %v1483_v5 = vor.u32 1.1754944e-38, %v1482_v21  ;;  %vm1481_vm15 = vcmp.eq.f32.partialorder %v1480_v26, 8.507059e+37 }
 0x39d   : > { %v1459_v8 = vmul.f32 %v2123_v3, %v1458_v56 }
 0x39e   : > { %v2125_v12 = vpop.eup %2124 }
 0x39f   : > { %v1487_v13 = vmul.f32 %v2125_v12, %v1440_v2  ;;  %v1460_v14 = vadd.f32 %v2123_v3, %v1459_v8  ;;  %vm1492_vm1 = vweird.f32 %v2125_v12  ;;  %v1619_v2 = vld [vmem:[#allocation13 + $0x18] sm:$0xff] }
 0x3a0   : > { %v2127_v10 = vpop.eup %2126  ;;  %vm1493_vm3 = vmor %vm1491_vm2, %vm1492_vm1  ;;  %1648 = vmatpush.msra.mxu2 %v1619_v2 }
 0x3a1   : > { %v1488_v54 = vsub.f32 1.0, %v1487_v13  ;;  %v1472_v16 = vmul.f32 %v2127_v10, %v1437_v49  ;;  %v1464_v34 = vsel %vm1463_vm10, %v2123_v3, %v1460_v14  ;;  %vm1477_vm12 = vweird.f32 %v2127_v10  ;;  %v1618_v3 = vld [vmem:[#allocation13 + $0x10] sm:$0xff]  ;;  %v1616_v49 = vld [vmem:[#allocation13] sm:$0xff] }
 0x3a2   : > { %v1469_v19 = vsel %vm1466_vm11, %v1468_v15, %v1464_v34  ;;  %vm1478_vm14 = vmor %vm1476_vm13, %vm1477_vm12  ;;  %1649 = vmatpush.msra.mxu2 %v1618_v3 }
 0x3a3   : > { %v1473_v7 = vsub.f32 1.0, %v1472_v16  ;;  %v1470_v20 = vmul.f32 %v2952_v60, %v1469_v19  ;;  %v1489_v17 = vmul.f32 %v2125_v12, %v1488_v54 }
 0x3a4   : > { %1650 = vmatpush.msra.mxu2 %v1617_v4 }
 0x3a5   : > { %v1474_v22 = vmul.f32 %v2127_v10, %v1473_v7  ;;  %1909 = vmatmul.msk.f32.gmra.mxu1 %vm713_vm0, %v1470_v20  ;;  %v1490_v32 = vadd.f32 %v2125_v12, %v1489_v17 }
 0x3a6   : > { %1651 = vmatpush.msra.mxu2 %v1616_v49 }
 0x3a7   : > { %v1475_v29 = vadd.f32 %v2127_v10, %v1474_v22  ;;  %v1494_v39 = vsel %vm1493_vm3, %v2125_v12, %v1490_v32 }
 0x3a8   : > { %v1499_v9 = vsel %vm1496_vm4, %v1498_v35, %v1494_v39 }
 0x3a9   : > { %v1479_v30 = vsel %vm1478_vm14, %v2127_v10, %v1475_v29  ;;  %v1500_v40 = vmul.f32 %v2956_v24, %v1499_v9 }
 0x3aa   : > { %v1484_v36 = vsel %vm1481_vm15, %v1483_v5, %v1479_v30 }
 0x3ab   : > { %v1485_v60 = vmul.f32 %v2958_v53, %v1484_v36  ;;  %v3046_v53 = vpop.f32.mrf.mxu3 }
 0x3ad   : > { %1910 = vmatmul.msk.f32.gmra.mxu1 %vm713_vm0, %v1485_v60  ;;  %v2063_v60 = vld [vmem:[%s3125_s10] ss:$0 sm:$0xff] }
 0x3b3   : > { %v1114_v38 = vpop.f32.mrf.mxu1  ;;  %v3048_v25 = vpop.f32.mrf.mxu3 }
 0x3b5   : > { %1911 = vmatmul.msk.f32.gmra.mxu1 %vm713_vm0, %v1500_v40 }
 0x3bb   : > { %v1117_v41 = vpop.f32.mrf.mxu1  ;;  %v3050_v48 = vpop.f32.mrf.mxu3 }
 0x3bc   : > { %v2055_v43 = vpack.i.bf16 %v1117_v41, %v1114_v38 }
 0x3be   : > { %2056 = vrot.lane.b32.xlu0 %v2055_v43, %s2426_s7 }
 0x3ce   : > { %v1120_v44 = vpop.f32.mrf.mxu1 }
 0x3df   : > { %v1123_v51 = vpop.f32.mrf.mxu1 }
 0x3e7   : > { %v1542_v52 = vpop.f32.mrf.mxu1 }
 0x3ef   : > { %v1328_v50 = vpop.f32.mrf.mxu3 }
 0x3f0   : > { %1574 = vrot.lane.b32.xlu1 %v1328_v50, %s2425_s9 }
 0x3f7   : > { %v1331_v24 = vpop.f32.mrf.mxu3 }
 0x3f8   : > { %1576 = vrot.lane.b32.xlu0 %v1331_v24, %s2425_s9 }
 0x3ff   : > { %v1334_v27 = vpop.f32.mrf.mxu3 }
 0x400   : > { %1578 = vrot.lane.b32.xlu1 %v1334_v27, %s2425_s9  ;;  %1590 = vrot.lane.b32.xlu0 %v1542_v52, %s2424_s13 }
 0x407   : > { %v1337_v42 = vpop.f32.mrf.mxu3 }
 0x408   : > { %1564 = vrot.lane.b32.xlu1 %v1123_v51, %s2426_s7  ;;  %1562 = vrot.lane.b32.xlu0 %v1120_v44, %s2426_s7 }
 0x422   : > { %v1545_v59 = vpop.f32.mrf.mxu1 }
 0x423   : > { %1592 = vrot.lane.b32.xlu2 %v1545_v59, %s2424_s13 }
 0x42a   : > { %v1548_v62 = vpop.f32.mrf.mxu1 }
 0x42b   : > { %1594 = vrot.lane.b32.xlu0 %v1548_v62, %s2424_s13 }
 0x430   : > { %v2057_v56 = vpop.permute.xlu0 %2056 }
 0x431   : > { %v2058_v8 = vunpack.i.l.bf16 %v2057_v56  ;;  %v2059_v15 = vunpack.i.h.bf16 %v2057_v56 }
 0x432   : > { %v1551_v28 = vpop.f32.mrf.mxu1 }
 0x433   : > { %1580 = vrot.lane.b32.xlu0 %v1337_v42, %s2425_s9  ;;  %1596 = vrot.lane.b32.xlu1 %v1551_v28, %s2424_s13  ;;  %v1602_v12 = vsel %vm713_vm0, %v3044_v47, %v2058_v8  ;;  %v1603_v54 = vsel %vm713_vm0, %v3046_v53, %v2059_v15 }
 0x462   : > { %v1575_v11 = vpop.permute.xlu1 %1574 }
 0x463   : > { %v1607_v13 = vsel %vm1606_vm5, %v1602_v12, %v1575_v11 }
 0x46a   : > { %v1577_v6 = vpop.permute.xlu0 %1576 }
 0x46b   : > { %v1608_v16 = vsel %vm1606_vm5, %v1603_v54, %v1577_v6 }
 0x472   : > { %v1591_v14 = vpop.permute.xlu0 %1590  ;;  %v1579_v7 = vpop.permute.xlu1 %1578 }
 0x473   : > { %v1612_v10 = vsel %vm1611_vm6, %v1607_v13, %v1591_v14 }
 0x474   : > { %1652 = vmatmul.f32.vlgmr.msra.gmra.mxu2 %v1612_v10 }
 0x47a   : > { %v1563_v20 = vpop.permute.xlu0 %1562  ;;  %v1565_v17 = vpop.permute.xlu1 %1564 }
 0x47b   : > { %v1604_v21 = vsel %vm713_vm0, %v3048_v25, %v1563_v20  ;;  %v1605_v5 = vsel %vm713_vm0, %v3050_v48, %v1565_v17 }
 0x47c   : > { %v1609_v26 = vsel %vm1606_vm5, %v1604_v21, %v1579_v7 }
 0x47d   : > { %v1593_v34 = vpop.permute.xlu2 %1592 }
 0x47e   : > { %v1613_v19 = vsel %vm1611_vm6, %v1608_v16, %v1593_v34 }
 0x47f   : > { %1655 = vmatmul.f32.gmra.mxu2 %v1613_v19 }
 0x49d   : > { %v1595_v22 = vpop.permute.xlu0 %1594 }
 0x49e   : > { %v1614_v29 = vsel %vm1611_vm6, %v1609_v26, %v1595_v22 }
 0x49f   : > { %1658 = vmatmul.f32.gmra.mxu2 %v1614_v29 }
 0x4a5   : > { %v1581_v30 = vpop.permute.xlu0 %1580  ;;  %v1597_v32 = vpop.permute.xlu1 %1596 }
 0x4a6   : > { %v1610_v33 = vsel %vm1606_vm5, %v1605_v5, %v1581_v30 }
 0x4a7   : > { %v1615_v36 = vsel %vm1611_vm6, %v1610_v33, %v1597_v32 }
 0x4a8   : > { %1661 = vmatmul.f32.gmra.mxu2 %v1615_v36 }
 0x4f7   : > { %v1653_v37 = vpop.f32.mrf.mxu2 }
 0x4f8   : > { %v1654_v39 = vadd.f32 %v2063_v60, %v1653_v37 }
 0x4fa   : > { %1665 = vst [vmem:[%s553_s30] sm:$0xff] %v1654_v39 }
 0x502   : > { %v1656_v35 = vpop.f32.mrf.mxu2 }
 0x503   : > { %v1657_v9 = vadd.f32 %v2063_v60, %v1656_v35 }
 0x505   : > { %1666 = vst [vmem:[%s553_s30 + $0x8] sm:$0xff] %v1657_v9 }
 0x522   : > { %v1659_v38 = vpop.f32.mrf.mxu2 }
 0x523   : > { %v1660_v40 = vadd.f32 %v2063_v60, %v1659_v38 }
 0x525   : > { %1667 = vst [vmem:[%s553_s30 + $0x10] sm:$0xff] %v1660_v40 }
 0x52b   : > { %v1662_v41 = vpop.f32.mrf.mxu2 }
 0x52c   : > { %v1663_v43 = vadd.f32 %v2063_v60, %v1662_v41 }
 0x52e   : > { %1668 = vst [vmem:[%s553_s30 + $0x18] sm:$0xff] %v1663_v43 }
 0x52f   : > { %2365 = shalt.err (!%p2362_p13)
}
 0x530   : > { %s2427_s15 = smov 128   ;;  %s2428_s7 = smov 8  }
 0x531   : > { %1943 = dma.vmem_to_hbm [thread:$0]  (%p2569_p3), %s1683_s25, 512, %s1685_s14, %s1670_s26, %s2427_s15, %s2427_s15, %s2428_s7  }
 0x532 PF: > { %s3171_s29 = sld [smem:[#allocation20_spill]] }
 0x533   : > { %s3173_s3 = sld [smem:[#allocation21_spill]] }
 0x538   : > { %s1699_s5 = sand.u32 1, %s3171_s29  }
 0x539   : > { %p3174_p0 = scmp.ge.s32.totalorder %s3173_s3, 2  ;;  %s1700_s30 = scalar_lea.sflag [#allocation4], %s1699_s5 }
 0x53b   : > { %p1969_p8 = pnand %p3174_p0, %p2524_p6 }
 0x53d   : > { %p1970_p9 = pneg %p1969_p8 }
 0x53f   : > { %2399 = dma.done.wait (%p1970_p9), %s1700_s30, 512  }
 0x540   : > { %2401 = vsyncadd (%p1970_p9), %s1700_s30, 4294966784  ;;  %s3175_s20 = sld [smem:[#allocation23_spill]]  ;;  %s3177_s17 = smov %s2408_s18 }
 0x541   : > { %s3176_s24 = sld [smem:[#allocation24_spill]]  ;;  %s3178_s18 = smov %s2412_s19 }
 0x546   : > { %p29_p12 = scmp.ge.s32.totalorder %s3175_s20, 4  }
 0x547   : > { %s3179_s19 = smov %s3176_s24 }
 0x548   :  { %31 = sbr.rel (!%p29_p12) target bundleno = 16 (0x10), region = 149 }
 0x54d   :  { %1706 = vsyncpa [#allocation3], 1 }
 0x54e   :  { %1708 = vsyncpa [#allocation3 + $0x1], 1 }
 0x54f   :  { %1709 = vsyncpa [#allocation6], 1 }
 0x550   :  { %1711 = vsyncpa [#allocation6 + $0x1], 1 }
 0x551   :  { %1712 = vsyncpa [#allocation9], 1 }
 0x552   :  { %1713 = vsyncpa [#allocation12], 1 }
 0x553   :  { %1714 = vsyncpa [#allocation4], 1 }
 0x554   :  { %1716 = vsyncpa [#allocation4 + $0x1], 1 }

</bundles_post_ra>
